<compile_context>
chip_gen: v5e
topology: v5e:2x2
jax: 0.10.0
libtpu: 0.0.40
codegen_flags: <defaults>
</compile_context>

<pallas_src>
import functools

import jax
import jax.numpy as jnp
from jax.experimental import pallas as pl
from jax.experimental.pallas import tpu as pltpu


_CIN = 3
_CIN_P = 8                      # conv1 Cin zero-padded 3 -> 8 for aligned taps
_C1 = 32
_C2 = 64
_LANES = 128
_TAPS = tuple((dh, dw) for dh in (-1, 0, 1) for dw in (-1, 0, 1))  # kh-major

# Weight-slab row sections (starts are multiples of 16 so bf16 (16,128) tiles
# slice cleanly inside the kernel).
_W1_ROWS = 9 * _CIN_P           # 72
_W2_OFF = 80                    # 72 rounded up to a multiple of 16
_W2_ROWS = 9 * _C1              # 288
_FC_OFF = _W2_OFF + _W2_ROWS    # 368
_FC_ROWS = 2 * _C2              # 128 (= 2 pooled spatial positions * 64 ch)
_WSLAB_ROWS = _FC_OFF + _FC_ROWS


# ---------------------------------------------------------------------------
# Parameters (PyTorch layout) and packing into kernel layout
# ---------------------------------------------------------------------------

def init_torch_params(key, num_classes=10):
    k1, k2, k3, k4, k5, k6 = jax.random.split(key, 6)
    return dict(
        w1=jax.random.normal(k1, (32, 3, 3, 3), jnp.float32) * 0.1,   # (Cout,Cin,kh,kw)
        b1=jax.random.normal(k2, (32,), jnp.float32) * 0.1,
        w2=jax.random.normal(k3, (64, 32, 3, 3), jnp.float32) * 0.05,
        b2=jax.random.normal(k4, (64,), jnp.float32) * 0.05,
        wfc=jax.random.normal(k5, (num_classes, 128), jnp.float32) * 0.05,  # (out,in)
        bfc=jax.random.normal(k6, (num_classes,), jnp.float32) * 0.05,
    )


def pack_params(tp):
    """Repack PyTorch weights into two operand slabs (one bf16, one f32)."""
    nc = tp["wfc"].shape[0]
    assert nc <= _LANES

    # conv taps: (Cout,Cin,kh,kw) -> rows = (tap, cin), cols = cout
    w1 = jnp.transpose(tp["w1"], (2, 3, 1, 0)).reshape(9, _CIN, _C1)
    w1 = jnp.pad(w1, ((0, 0), (0, _CIN_P - _CIN), (0, 0))).reshape(_W1_ROWS, _C1)
    w2 = jnp.transpose(tp["w2"], (2, 3, 1, 0)).reshape(_W2_ROWS, _C2)

    # classifier: PyTorch flat index = c*P3 + pos; kernel lane index = pos*64 + c.
    P3 = _FC_ROWS // _C2
    wfc = jnp.transpose(tp["wfc"].reshape(nc, _C2, P3), (2, 1, 0)).reshape(_FC_ROWS, nc)

    w1p = jnp.pad(w1, ((0, _W2_OFF - _W1_ROWS), (0, _LANES - _C1)))
    w2p = jnp.pad(w2, ((0, 0), (0, _LANES - _C2)))
    wfcp = jnp.pad(wfc, ((0, 0), (0, _LANES - nc)))
    wslab = jnp.concatenate([w1p, w2p, wfcp], axis=0).astype(jnp.bfloat16)

    bslab = jnp.stack([
        jnp.pad(tp["b1"], (0, _LANES - _C1)),
        jnp.pad(tp["b2"], (0, _LANES - _C2)),
        jnp.pad(tp["bfc"], (0, _LANES - nc)),
    ]).astype(jnp.float32)

    return dict(wslab=wslab, bslab=bslab)


# ---------------------------------------------------------------------------
# Fused Pallas forward pass
# ---------------------------------------------------------------------------

def forward(params, x_nchw, num_classes=10):
    """Fused forward pass.  x_nchw: (B, 3, H, W) with (H/4)*(W/4) == 2."""
    B, Cin, H1, W1 = x_nchw.shape
    assert Cin == _CIN and H1 % 4 == 0 and W1 % 4 == 0
    H2, W2 = H1 // 2, W1 // 2
    H3, W3 = H2 // 2, W2 // 2
    P3 = H3 * W3
    assert _C2 * P3 == _FC_ROWS, "Linear(128, ...) requires (H/4)*(W/4) == 2"

    pitch1, pitch2 = W1 + 2, W2 + 2                    # padded row pitch (w halo)
    img1, img2 = (H1 + 2) * pitch1, (H2 + 2) * pitch2  # rows per padded image
    Rp1, Rp2 = B * img1, B * img2
    G1 = -(-(pitch1 + 1) // 8) * 8                      # guard rows (>= max |tap shift|)
    G2 = -(-(pitch2 + 1) // 8) * 8
    offs1 = tuple(dh * pitch1 + dw for dh, dw in _TAPS)
    offs2 = tuple(dh * pitch2 + dw for dh, dw in _TAPS)
    OUT_ROWS = max(8, -(-B // 8) * 8)

    # NCHW -> NHWC -> zero spatial halo + channel pad -> flat rows (b, hp, wp),
    # plus zero guard rows so in-kernel shifted tap slices never go OOB.
    xp = jnp.transpose(x_nchw, (0, 2, 3, 1))
    xp = jnp.pad(xp, ((0, 0), (1, 1), (1, 1), (0, _CIN_P - _CIN)))
    xp = xp.reshape(Rp1, _CIN_P)
    xp = jnp.pad(xp, ((G1, G1), (0, 0)))                # (G1 + Rp1 + G1, 8) f32

    wslab, bslab = params["wslab"], params["bslab"]
    bf16, f32 = jnp.bfloat16, jnp.float32

    def kernel(x_ref, w_ref, b_ref, out_ref, z1s, a2s, z2s, zfs):
        # --- conv1: 9 shifted contiguous row slices -> one im2col slab ->
        #            one MXU matmul (zero halos provide the border padding).
        cols1 = jnp.concatenate(
            [x_ref[G1 + off:G1 + off + Rp1, :] for off in offs1], axis=1)
        h1 = jnp.dot(cols1.astype(bf16), w_ref[0:_W1_ROWS, 0:_C1],
                     preferred_element_type=f32)
        z1s[...] = jnp.maximum(h1 + b_ref[0:1, 0:_C1], 0.0)

        # --- pool1 (2x2/2): per (b, h_out) row-block max, written straight
        #     into the zero-haloed conv2 input buffer (halos stay zero).
        a2s[...] = jnp.zeros_like(a2s)
        for b in range(B):
            for ho in range(H2):
                src = b * img1 + (2 * ho + 1) * pitch1 + 1
                m = jnp.maximum(z1s[src:src + W1, :],
                                z1s[src + pitch1:src + pitch1 + W1, :])
                dst = G2 + b * img2 + (ho + 1) * pitch2 + 1
                for wo in range(W2):
                    a2s[dst + wo, :] = jnp.maximum(m[2 * wo], m[2 * wo + 1])

        # --- conv2: same im2col + single matmul scheme.
        cols2 = jnp.concatenate(
            [a2s[G2 + off:G2 + off + Rp2, :] for off in offs2], axis=1)
        h2 = jnp.dot(cols2.astype(bf16), w_ref[_W2_OFF:_W2_OFF + _W2_ROWS, 0:_C2],
                     preferred_element_type=f32)
        z2s[...] = jnp.maximum(h2 + b_ref[1:2, 0:_C2], 0.0)

        # --- pool2 -> lane-dense (OUT_ROWS, 128) classifier slab.
        #     zf[b, pos*64 + c] == PyTorch flat feature c*P3 + pos (the NCHW
        #     flatten permutation is folded into the packed FC weights).
        zfs[...] = jnp.zeros_like(zfs)
        for b in range(B):
            parts = []
            for ho in range(H3):
                for wo in range(W3):
                    r = b * img2 + (2 * ho + 1) * pitch2 + (2 * wo + 1)
                    m = jnp.maximum(z2s[r:r + 2, :],
                                    z2s[r + pitch2:r + pitch2 + 2, :])
                    parts.append(jnp.maximum(m[0], m[1]))
            zfs[b, :] = jnp.concatenate(parts, axis=0)

        # --- classifier: one K=128 matmul, lane/sublane-dense output block.
        acc = jnp.dot(zfs[...].astype(bf16), w_ref[_FC_OFF:_FC_OFF + _FC_ROWS, :],
                      preferred_element_type=f32)
        out_ref[...] = acc + b_ref[2:3, :]

    operands = (xp, wslab, bslab)
    out = pl.pallas_call(
        kernel,
        out_shape=jax.ShapeDtypeStruct((OUT_ROWS, _LANES), jnp.float32),
        grid=(1,),
        in_specs=[pl.BlockSpec(op.shape, lambda i: (0, 0)) for op in operands],
        out_specs=pl.BlockSpec((OUT_ROWS, _LANES), lambda i: (0, 0)),
        scratch_shapes=[
            pltpu.VMEM((Rp1, _C1), jnp.float32),            # z1s: conv1 ReLU out
            pltpu.VMEM((Rp2 + 2 * G2, _C1), jnp.float32),   # a2s: padded conv2 input
            pltpu.VMEM((Rp2, _C2), jnp.float32),            # z2s: conv2 ReLU out
            pltpu.VMEM((OUT_ROWS, _LANES), jnp.float32),    # zfs: FC input slab
        ],
        compiler_params=pltpu.CompilerParams(dimension_semantics=("arbitrary",)),
    )(*operands)

    return out[:B, :num_classes]


# ---------------------------------------------------------------------------
# Pure-JAX reference (mirrors the PyTorch module exactly) for a sanity check
# ---------------------------------------------------------------------------

def reference_forward(tp, x_nchw):
    HI = jax.lax.Precision.HIGHEST
    B, Cin, H, W = x_nchw.shape
    x = jnp.transpose(x_nchw, (0, 2, 3, 1))
    w1 = jnp.transpose(tp["w1"], (2, 3, 1, 0)).reshape(9 * Cin, 32)
    w2 = jnp.transpose(tp["w2"], (2, 3, 1, 0)).reshape(9 * 32, 64)

    def im2col(x4):
        b, h, w, c = x4.shape
        xp = jnp.pad(x4, ((0, 0), (1, 1), (1, 1), (0, 0)))
        cols = [xp[:, i:i + h, j:j + w, :] for i in range(3) for j in range(3)]
        return jnp.stack(cols, axis=3).reshape(b * h * w, 9 * c)

    def pool(x4):
        v = [x4[:, i::2, j::2, :] for i in range(2) for j in range(2)]
        return jnp.maximum(jnp.maximum(v[0], v[1]), jnp.maximum(v[2], v[3]))

    h1 = jnp.maximum(jnp.dot(im2col(x), w1, precision=HI) + tp["b1"], 0.0)
    h1 = pool(h1.reshape(B, H, W, 32))
    h2 = jnp.maximum(jnp.dot(im2col(h1), w2, precision=HI) + tp["b2"], 0.0)
    h2 = pool(h2.reshape(B, H // 2, W // 2, 64))
    flat = jnp.transpose(h2, (0, 3, 1, 2)).reshape(B, -1)
    return jnp.dot(flat, tp["wfc"].T, precision=HI) + tp["bfc"]


if __name__ == "__main__":
    key = jax.random.PRNGKey(0)
    pkey, xkey = jax.random.split(key)

    torch_params = init_torch_params(pkey, num_classes=10)
    params = pack_params(torch_params)

    # (B, 3, 8, 4): after two 2x2 pools -> 64 * 2 * 1 = 128 features,
    # matching the module's Linear(128, num_classes).
    x = jax.random.normal(xkey, (2, 3, 8, 4), jnp.float32)

    fwd = jax.jit(functools.partial(forward, num_classes=10))
    logits = fwd(params, x)
    jax.block_until_ready(logits)
    assert logits.shape == (2, 10) and logits.dtype == jnp.float32

    ref = reference_forward(torch_params, x)
    err = float(jnp.max(jnp.abs(logits - ref)))
    # bf16 MXU inputs (f32 accumulation) => looser tolerance than all-f32.
    assert err < 1e-1, f"kernel/reference mismatch: max abs err = {err}"
    print("KERNEL_OK")
</pallas_src>

<mosaic_0001>
module attributes {stable_mosaic.version = 11 : i64} {
  func.func @kernel(%arg0: i32, %arg1: memref<136x8xf32, #tpu.memory_space<vmem>>, %arg2: memref<496x128xbf16, #tpu.memory_space<vmem>>, %arg3: memref<3x128xf32, #tpu.memory_space<vmem>>, %arg4: memref<8x128xf32, #tpu.memory_space<vmem>>, %arg5: memref<120x32xf32, #tpu.memory_space<vmem>>, %arg6: memref<64x32xf32, #tpu.memory_space<vmem>>, %arg7: memref<48x64xf32, #tpu.memory_space<vmem>>, %arg8: memref<8x128xf32, #tpu.memory_space<vmem>>) attributes {dimension_semantics = [#tpu.dimension_semantics<arbitrary>], iteration_bounds = array<i64: 1>, scalar_prefetch = 0 : i64, scratch_operands = 4 : i64, tpu.core_type = #tpu.core_type<tc>, window_params = [{pipeline_mode = #tpu.pipeline_mode<synchronous>, transform_indices = @transform_0, window_bounds = array<i64: 136, 8>}, {pipeline_mode = #tpu.pipeline_mode<synchronous>, transform_indices = @transform_1, window_bounds = array<i64: 496, 128>}, {pipeline_mode = #tpu.pipeline_mode<synchronous>, transform_indices = @transform_2, window_bounds = array<i64: 3, 128>}, {pipeline_mode = #tpu.pipeline_mode<synchronous>, transform_indices = @transform_3, window_bounds = array<i64: 8, 128>}]} {
    %c1 = arith.constant 1 : index
    %c0 = arith.constant 0 : index
    %0 = vector.load %arg1[%c1, %c0] : memref<136x8xf32, #tpu.memory_space<vmem>>, vector<120x8xf32>
    %c2 = arith.constant 2 : index
    %c0_0 = arith.constant 0 : index
    %1 = vector.load %arg1[%c2, %c0_0] : memref<136x8xf32, #tpu.memory_space<vmem>>, vector<120x8xf32>
    %c3 = arith.constant 3 : index
    %c0_1 = arith.constant 0 : index
    %2 = vector.load %arg1[%c3, %c0_1] : memref<136x8xf32, #tpu.memory_space<vmem>>, vector<120x8xf32>
    %c7 = arith.constant 7 : index
    %c0_2 = arith.constant 0 : index
    %3 = vector.load %arg1[%c7, %c0_2] : memref<136x8xf32, #tpu.memory_space<vmem>>, vector<120x8xf32>
    %c8 = arith.constant 8 : index
    %c0_3 = arith.constant 0 : index
    %4 = vector.load %arg1[%c8, %c0_3] : memref<136x8xf32, #tpu.memory_space<vmem>>, vector<120x8xf32>
    %c9 = arith.constant 9 : index
    %c0_4 = arith.constant 0 : index
    %5 = vector.load %arg1[%c9, %c0_4] : memref<136x8xf32, #tpu.memory_space<vmem>>, vector<120x8xf32>
    %c13 = arith.constant 13 : index
    %c0_5 = arith.constant 0 : index
    %6 = vector.load %arg1[%c13, %c0_5] : memref<136x8xf32, #tpu.memory_space<vmem>>, vector<120x8xf32>
    %c14 = arith.constant 14 : index
    %c0_6 = arith.constant 0 : index
    %7 = vector.load %arg1[%c14, %c0_6] : memref<136x8xf32, #tpu.memory_space<vmem>>, vector<120x8xf32>
    %c15 = arith.constant 15 : index
    %c0_7 = arith.constant 0 : index
    %8 = vector.load %arg1[%c15, %c0_7] : memref<136x8xf32, #tpu.memory_space<vmem>>, vector<120x8xf32>
    %9 = tpu.concatenate %0, %1, %2, %3, %4, %5, %6, %7, %8 in 1 : vector<120x8xf32>, vector<120x8xf32>, vector<120x8xf32>, vector<120x8xf32>, vector<120x8xf32>, vector<120x8xf32>, vector<120x8xf32>, vector<120x8xf32>, vector<120x8xf32> -> vector<120x72xf32>
    %10 = arith.truncf %9 : vector<120x72xf32> to vector<120x72xbf16>
    %c0_8 = arith.constant 0 : index
    %c0_9 = arith.constant 0 : index
    %11 = vector.load %arg2[%c0_8, %c0_9] : memref<496x128xbf16, #tpu.memory_space<vmem>>, vector<72x32xbf16>
    %cst = arith.constant dense<0.000000e+00> : vector<120x32xf32>
    %12 = tpu.matmul %10, %11, %cst {dimension_numbers = #tpu.dot_dimension_numbers<[1], [0], [0], [1], [0, 0, 1, 1], [], []>} : vector<120x72xbf16>, vector<72x32xbf16>, vector<120x32xf32> -> vector<120x32xf32>
    %c0_10 = arith.constant 0 : index
    %c0_11 = arith.constant 0 : index
    %13 = vector.load %arg3[%c0_10, %c0_11] : memref<3x128xf32, #tpu.memory_space<vmem>>, vector<1x32xf32>
    %14 = vector.broadcast %13 : vector<1x32xf32> to vector<120x32xf32>
    %15 = arith.addf %12, %14 : vector<120x32xf32>
    %cst_12 = arith.constant 0.000000e+00 : f32
    %16 = vector.broadcast %cst_12 : f32 to vector<120x32xf32>
    %17 = arith.maximumf %15, %16 : vector<120x32xf32>
    %c0_13 = arith.constant 0 : index
    %c0_14 = arith.constant 0 : index
    %18 = vector.load %arg5[%c0_13, %c0_14] : memref<120x32xf32, #tpu.memory_space<vmem>>, vector<120x32xf32>
    tpu.vector_store %arg5[%c0_13, %c0_14], %17 {strides = array<i32>} : memref<120x32xf32, #tpu.memory_space<vmem>>, vector<120x32xf32>,
    %cst_15 = arith.constant 0.000000e+00 : f32
    %19 = vector.broadcast %cst_15 : f32 to vector<64x32xf32>
    %c0_16 = arith.constant 0 : index
    %c0_17 = arith.constant 0 : index
    %20 = vector.load %arg6[%c0_16, %c0_17] : memref<64x32xf32, #tpu.memory_space<vmem>>, vector<64x32xf32>
    tpu.vector_store %arg6[%c0_16, %c0_17], %19 {strides = array<i32>} : memref<64x32xf32, #tpu.memory_space<vmem>>, vector<64x32xf32>,
    %c7_18 = arith.constant 7 : index
    %c0_19 = arith.constant 0 : index
    %21 = vector.load %arg5[%c7_18, %c0_19] : memref<120x32xf32, #tpu.memory_space<vmem>>, vector<4x32xf32>
    %c13_20 = arith.constant 13 : index
    %c0_21 = arith.constant 0 : index
    %22 = vector.load %arg5[%c13_20, %c0_21] : memref<120x32xf32, #tpu.memory_space<vmem>>, vector<4x32xf32>
    %23 = arith.maximumf %21, %22 : vector<4x32xf32>
    %24 = vector.extract_strided_slice %23 {offsets = [0, 0], sizes = [1, 32], strides = [1, 1]} : vector<4x32xf32> to vector<1x32xf32>
    %25 = vector.shape_cast %24 : vector<1x32xf32> to vector<32xf32>
    %26 = vector.extract_strided_slice %23 {offsets = [1, 0], sizes = [1, 32], strides = [1, 1]} : vector<4x32xf32> to vector<1x32xf32>
    %27 = vector.shape_cast %26 : vector<1x32xf32> to vector<32xf32>
    %28 = arith.maximumf %25, %27 : vector<32xf32>
    %c13_22 = arith.constant 13 : index
    %c0_23 = arith.constant 0 : index
    %29 = vector.load %arg6[%c13_22, %c0_23] : memref<64x32xf32, #tpu.memory_space<vmem>>, vector<1x32xf32>
    %30 = vector.shape_cast %29 : vector<1x32xf32> to vector<32xf32>
    %31 = vector.shape_cast %28 : vector<32xf32> to vector<1x32xf32>
    tpu.vector_store %arg6[%c13_22, %c0_23], %31 {strides = array<i32>} : memref<64x32xf32, #tpu.memory_space<vmem>>, vector<1x32xf32>,
    %32 = vector.extract_strided_slice %23 {offsets = [2, 0], sizes = [1, 32], strides = [1, 1]} : vector<4x32xf32> to vector<1x32xf32>
    %33 = vector.shape_cast %32 : vector<1x32xf32> to vector<32xf32>
    %34 = vector.extract_strided_slice %23 {offsets = [3, 0], sizes = [1, 32], strides = [1, 1]} : vector<4x32xf32> to vector<1x32xf32>
    %35 = vector.shape_cast %34 : vector<1x32xf32> to vector<32xf32>
    %36 = arith.maximumf %33, %35 : vector<32xf32>
    %c14_24 = arith.constant 14 : index
    %c0_25 = arith.constant 0 : index
    %37 = vector.load %arg6[%c14_24, %c0_25] : memref<64x32xf32, #tpu.memory_space<vmem>>, vector<1x32xf32>
    %38 = vector.shape_cast %37 : vector<1x32xf32> to vector<32xf32>
    %39 = vector.shape_cast %36 : vector<32xf32> to vector<1x32xf32>
    tpu.vector_store %arg6[%c14_24, %c0_25], %39 {strides = array<i32>} : memref<64x32xf32, #tpu.memory_space<vmem>>, vector<1x32xf32>,
    %c19 = arith.constant 19 : index
    %c0_26 = arith.constant 0 : index
    %40 = vector.load %arg5[%c19, %c0_26] : memref<120x32xf32, #tpu.memory_space<vmem>>, vector<4x32xf32>
    %c25 = arith.constant 25 : index
    %c0_27 = arith.constant 0 : index
    %41 = vector.load %arg5[%c25, %c0_27] : memref<120x32xf32, #tpu.memory_space<vmem>>, vector<4x32xf32>
    %42 = arith.maximumf %40, %41 : vector<4x32xf32>
    %43 = vector.extract_strided_slice %42 {offsets = [0, 0], sizes = [1, 32], strides = [1, 1]} : vector<4x32xf32> to vector<1x32xf32>
    %44 = vector.shape_cast %43 : vector<1x32xf32> to vector<32xf32>
    %45 = vector.extract_strided_slice %42 {offsets = [1, 0], sizes = [1, 32], strides = [1, 1]} : vector<4x32xf32> to vector<1x32xf32>
    %46 = vector.shape_cast %45 : vector<1x32xf32> to vector<32xf32>
    %47 = arith.maximumf %44, %46 : vector<32xf32>
    %c17 = arith.constant 17 : index
    %c0_28 = arith.constant 0 : index
    %48 = vector.load %arg6[%c17, %c0_28] : memref<64x32xf32, #tpu.memory_space<vmem>>, vector<1x32xf32>
    %49 = vector.shape_cast %48 : vector<1x32xf32> to vector<32xf32>
    %50 = vector.shape_cast %47 : vector<32xf32> to vector<1x32xf32>
    tpu.vector_store %arg6[%c17, %c0_28], %50 {strides = array<i32>} : memref<64x32xf32, #tpu.memory_space<vmem>>, vector<1x32xf32>,
    %51 = vector.extract_strided_slice %42 {offsets = [2, 0], sizes = [1, 32], strides = [1, 1]} : vector<4x32xf32> to vector<1x32xf32>
    %52 = vector.shape_cast %51 : vector<1x32xf32> to vector<32xf32>
    %53 = vector.extract_strided_slice %42 {offsets = [3, 0], sizes = [1, 32], strides = [1, 1]} : vector<4x32xf32> to vector<1x32xf32>
    %54 = vector.shape_cast %53 : vector<1x32xf32> to vector<32xf32>
    %55 = arith.maximumf %52, %54 : vector<32xf32>
    %c18 = arith.constant 18 : index
    %c0_29 = arith.constant 0 : index
    %56 = vector.load %arg6[%c18, %c0_29] : memref<64x32xf32, #tpu.memory_space<vmem>>, vector<1x32xf32>
    %57 = vector.shape_cast %56 : vector<1x32xf32> to vector<32xf32>
    %58 = vector.shape_cast %55 : vector<32xf32> to vector<1x32xf32>
    tpu.vector_store %arg6[%c18, %c0_29], %58 {strides = array<i32>} : memref<64x32xf32, #tpu.memory_space<vmem>>, vector<1x32xf32>,
    %c31 = arith.constant 31 : index
    %c0_30 = arith.constant 0 : index
    %59 = vector.load %arg5[%c31, %c0_30] : memref<120x32xf32, #tpu.memory_space<vmem>>, vector<4x32xf32>
    %c37 = arith.constant 37 : index
    %c0_31 = arith.constant 0 : index
    %60 = vector.load %arg5[%c37, %c0_31] : memref<120x32xf32, #tpu.memory_space<vmem>>, vector<4x32xf32>
    %61 = arith.maximumf %59, %60 : vector<4x32xf32>
    %62 = vector.extract_strided_slice %61 {offsets = [0, 0], sizes = [1, 32], strides = [1, 1]} : vector<4x32xf32> to vector<1x32xf32>
    %63 = vector.shape_cast %62 : vector<1x32xf32> to vector<32xf32>
    %64 = vector.extract_strided_slice %61 {offsets = [1, 0], sizes = [1, 32], strides = [1, 1]} : vector<4x32xf32> to vector<1x32xf32>
    %65 = vector.shape_cast %64 : vector<1x32xf32> to vector<32xf32>
    %66 = arith.maximumf %63, %65 : vector<32xf32>
    %c21 = arith.constant 21 : index
    %c0_32 = arith.constant 0 : index
    %67 = vector.load %arg6[%c21, %c0_32] : memref<64x32xf32, #tpu.memory_space<vmem>>, vector<1x32xf32>
    %68 = vector.shape_cast %67 : vector<1x32xf32> to vector<32xf32>
    %69 = vector.shape_cast %66 : vector<32xf32> to vector<1x32xf32>
    tpu.vector_store %arg6[%c21, %c0_32], %69 {strides = array<i32>} : memref<64x32xf32, #tpu.memory_space<vmem>>, vector<1x32xf32>,
    %70 = vector.extract_strided_slice %61 {offsets = [2, 0], sizes = [1, 32], strides = [1, 1]} : vector<4x32xf32> to vector<1x32xf32>
    %71 = vector.shape_cast %70 : vector<1x32xf32> to vector<32xf32>
    %72 = vector.extract_strided_slice %61 {offsets = [3, 0], sizes = [1, 32], strides = [1, 1]} : vector<4x32xf32> to vector<1x32xf32>
    %73 = vector.shape_cast %72 : vector<1x32xf32> to vector<32xf32>
    %74 = arith.maximumf %71, %73 : vector<32xf32>
    %c22 = arith.constant 22 : index
    %c0_33 = arith.constant 0 : index
    %75 = vector.load %arg6[%c22, %c0_33] : memref<64x32xf32, #tpu.memory_space<vmem>>, vector<1x32xf32>
    %76 = vector.shape_cast %75 : vector<1x32xf32> to vector<32xf32>
    %77 = vector.shape_cast %74 : vector<32xf32> to vector<1x32xf32>
    tpu.vector_store %arg6[%c22, %c0_33], %77 {strides = array<i32>} : memref<64x32xf32, #tpu.memory_space<vmem>>, vector<1x32xf32>,
    %c43 = arith.constant 43 : index
    %c0_34 = arith.constant 0 : index
    %78 = vector.load %arg5[%c43, %c0_34] : memref<120x32xf32, #tpu.memory_space<vmem>>, vector<4x32xf32>
    %c49 = arith.constant 49 : index
    %c0_35 = arith.constant 0 : index
    %79 = vector.load %arg5[%c49, %c0_35] : memref<120x32xf32, #tpu.memory_space<vmem>>, vector<4x32xf32>
    %80 = arith.maximumf %78, %79 : vector<4x32xf32>
    %81 = vector.extract_strided_slice %80 {offsets = [0, 0], sizes = [1, 32], strides = [1, 1]} : vector<4x32xf32> to vector<1x32xf32>
    %82 = vector.shape_cast %81 : vector<1x32xf32> to vector<32xf32>
    %83 = vector.extract_strided_slice %80 {offsets = [1, 0], sizes = [1, 32], strides = [1, 1]} : vector<4x32xf32> to vector<1x32xf32>
    %84 = vector.shape_cast %83 : vector<1x32xf32> to vector<32xf32>
    %85 = arith.maximumf %82, %84 : vector<32xf32>
    %c25_36 = arith.constant 25 : index
    %c0_37 = arith.constant 0 : index
    %86 = vector.load %arg6[%c25_36, %c0_37] : memref<64x32xf32, #tpu.memory_space<vmem>>, vector<1x32xf32>
    %87 = vector.shape_cast %86 : vector<1x32xf32> to vector<32xf32>
    %88 = vector.shape_cast %85 : vector<32xf32> to vector<1x32xf32>
    tpu.vector_store %arg6[%c25_36, %c0_37], %88 {strides = array<i32>} : memref<64x32xf32, #tpu.memory_space<vmem>>, vector<1x32xf32>,
    %89 = vector.extract_strided_slice %80 {offsets = [2, 0], sizes = [1, 32], strides = [1, 1]} : vector<4x32xf32> to vector<1x32xf32>
    %90 = vector.shape_cast %89 : vector<1x32xf32> to vector<32xf32>
    %91 = vector.extract_strided_slice %80 {offsets = [3, 0], sizes = [1, 32], strides = [1, 1]} : vector<4x32xf32> to vector<1x32xf32>
    %92 = vector.shape_cast %91 : vector<1x32xf32> to vector<32xf32>
    %93 = arith.maximumf %90, %92 : vector<32xf32>
    %c26 = arith.constant 26 : index
    %c0_38 = arith.constant 0 : index
    %94 = vector.load %arg6[%c26, %c0_38] : memref<64x32xf32, #tpu.memory_space<vmem>>, vector<1x32xf32>
    %95 = vector.shape_cast %94 : vector<1x32xf32> to vector<32xf32>
    %96 = vector.shape_cast %93 : vector<32xf32> to vector<1x32xf32>
    tpu.vector_store %arg6[%c26, %c0_38], %96 {strides = array<i32>} : memref<64x32xf32, #tpu.memory_space<vmem>>, vector<1x32xf32>,
    %c67 = arith.constant 67 : index
    %c0_39 = arith.constant 0 : index
    %97 = vector.load %arg5[%c67, %c0_39] : memref<120x32xf32, #tpu.memory_space<vmem>>, vector<4x32xf32>
    %c73 = arith.constant 73 : index
    %c0_40 = arith.constant 0 : index
    %98 = vector.load %arg5[%c73, %c0_40] : memref<120x32xf32, #tpu.memory_space<vmem>>, vector<4x32xf32>
    %99 = arith.maximumf %97, %98 : vector<4x32xf32>
    %100 = vector.extract_strided_slice %99 {offsets = [0, 0], sizes = [1, 32], strides = [1, 1]} : vector<4x32xf32> to vector<1x32xf32>
    %101 = vector.shape_cast %100 : vector<1x32xf32> to vector<32xf32>
    %102 = vector.extract_strided_slice %99 {offsets = [1, 0], sizes = [1, 32], strides = [1, 1]} : vector<4x32xf32> to vector<1x32xf32>
    %103 = vector.shape_cast %102 : vector<1x32xf32> to vector<32xf32>
    %104 = arith.maximumf %101, %103 : vector<32xf32>
    %c37_41 = arith.constant 37 : index
    %c0_42 = arith.constant 0 : index
    %105 = vector.load %arg6[%c37_41, %c0_42] : memref<64x32xf32, #tpu.memory_space<vmem>>, vector<1x32xf32>
    %106 = vector.shape_cast %105 : vector<1x32xf32> to vector<32xf32>
    %107 = vector.shape_cast %104 : vector<32xf32> to vector<1x32xf32>
    tpu.vector_store %arg6[%c37_41, %c0_42], %107 {strides = array<i32>} : memref<64x32xf32, #tpu.memory_space<vmem>>, vector<1x32xf32>,
    %108 = vector.extract_strided_slice %99 {offsets = [2, 0], sizes = [1, 32], strides = [1, 1]} : vector<4x32xf32> to vector<1x32xf32>
    %109 = vector.shape_cast %108 : vector<1x32xf32> to vector<32xf32>
    %110 = vector.extract_strided_slice %99 {offsets = [3, 0], sizes = [1, 32], strides = [1, 1]} : vector<4x32xf32> to vector<1x32xf32>
    %111 = vector.shape_cast %110 : vector<1x32xf32> to vector<32xf32>
    %112 = arith.maximumf %109, %111 : vector<32xf32>
    %c38 = arith.constant 38 : index
    %c0_43 = arith.constant 0 : index
    %113 = vector.load %arg6[%c38, %c0_43] : memref<64x32xf32, #tpu.memory_space<vmem>>, vector<1x32xf32>
    %114 = vector.shape_cast %113 : vector<1x32xf32> to vector<32xf32>
    %115 = vector.shape_cast %112 : vector<32xf32> to vector<1x32xf32>
    tpu.vector_store %arg6[%c38, %c0_43], %115 {strides = array<i32>} : memref<64x32xf32, #tpu.memory_space<vmem>>, vector<1x32xf32>,
    %c79 = arith.constant 79 : index
    %c0_44 = arith.constant 0 : index
    %116 = vector.load %arg5[%c79, %c0_44] : memref<120x32xf32, #tpu.memory_space<vmem>>, vector<4x32xf32>
    %c85 = arith.constant 85 : index
    %c0_45 = arith.constant 0 : index
    %117 = vector.load %arg5[%c85, %c0_45] : memref<120x32xf32, #tpu.memory_space<vmem>>, vector<4x32xf32>
    %118 = arith.maximumf %116, %117 : vector<4x32xf32>
    %119 = vector.extract_strided_slice %118 {offsets = [0, 0], sizes = [1, 32], strides = [1, 1]} : vector<4x32xf32> to vector<1x32xf32>
    %120 = vector.shape_cast %119 : vector<1x32xf32> to vector<32xf32>
    %121 = vector.extract_strided_slice %118 {offsets = [1, 0], sizes = [1, 32], strides = [1, 1]} : vector<4x32xf32> to vector<1x32xf32>
    %122 = vector.shape_cast %121 : vector<1x32xf32> to vector<32xf32>
    %123 = arith.maximumf %120, %122 : vector<32xf32>
    %c41 = arith.constant 41 : index
    %c0_46 = arith.constant 0 : index
    %124 = vector.load %arg6[%c41, %c0_46] : memref<64x32xf32, #tpu.memory_space<vmem>>, vector<1x32xf32>
    %125 = vector.shape_cast %124 : vector<1x32xf32> to vector<32xf32>
    %126 = vector.shape_cast %123 : vector<32xf32> to vector<1x32xf32>
    tpu.vector_store %arg6[%c41, %c0_46], %126 {strides = array<i32>} : memref<64x32xf32, #tpu.memory_space<vmem>>, vector<1x32xf32>,
    %127 = vector.extract_strided_slice %118 {offsets = [2, 0], sizes = [1, 32], strides = [1, 1]} : vector<4x32xf32> to vector<1x32xf32>
    %128 = vector.shape_cast %127 : vector<1x32xf32> to vector<32xf32>
    %129 = vector.extract_strided_slice %118 {offsets = [3, 0], sizes = [1, 32], strides = [1, 1]} : vector<4x32xf32> to vector<1x32xf32>
    %130 = vector.shape_cast %129 : vector<1x32xf32> to vector<32xf32>
    %131 = arith.maximumf %128, %130 : vector<32xf32>
    %c42 = arith.constant 42 : index
    %c0_47 = arith.constant 0 : index
    %132 = vector.load %arg6[%c42, %c0_47] : memref<64x32xf32, #tpu.memory_space<vmem>>, vector<1x32xf32>
    %133 = vector.shape_cast %132 : vector<1x32xf32> to vector<32xf32>
    %134 = vector.shape_cast %131 : vector<32xf32> to vector<1x32xf32>
    tpu.vector_store %arg6[%c42, %c0_47], %134 {strides = array<i32>} : memref<64x32xf32, #tpu.memory_space<vmem>>, vector<1x32xf32>,
    %c91 = arith.constant 91 : index
    %c0_48 = arith.constant 0 : index
    %135 = vector.load %arg5[%c91, %c0_48] : memref<120x32xf32, #tpu.memory_space<vmem>>, vector<4x32xf32>
    %c97 = arith.constant 97 : index
    %c0_49 = arith.constant 0 : index
    %136 = vector.load %arg5[%c97, %c0_49] : memref<120x32xf32, #tpu.memory_space<vmem>>, vector<4x32xf32>
    %137 = arith.maximumf %135, %136 : vector<4x32xf32>
    %138 = vector.extract_strided_slice %137 {offsets = [0, 0], sizes = [1, 32], strides = [1, 1]} : vector<4x32xf32> to vector<1x32xf32>
    %139 = vector.shape_cast %138 : vector<1x32xf32> to vector<32xf32>
    %140 = vector.extract_strided_slice %137 {offsets = [1, 0], sizes = [1, 32], strides = [1, 1]} : vector<4x32xf32> to vector<1x32xf32>
    %141 = vector.shape_cast %140 : vector<1x32xf32> to vector<32xf32>
    %142 = arith.maximumf %139, %141 : vector<32xf32>
    %c45 = arith.constant 45 : index
    %c0_50 = arith.constant 0 : index
    %143 = vector.load %arg6[%c45, %c0_50] : memref<64x32xf32, #tpu.memory_space<vmem>>, vector<1x32xf32>
    %144 = vector.shape_cast %143 : vector<1x32xf32> to vector<32xf32>
    %145 = vector.shape_cast %142 : vector<32xf32> to vector<1x32xf32>
    tpu.vector_store %arg6[%c45, %c0_50], %145 {strides = array<i32>} : memref<64x32xf32, #tpu.memory_space<vmem>>, vector<1x32xf32>,
    %146 = vector.extract_strided_slice %137 {offsets = [2, 0], sizes = [1, 32], strides = [1, 1]} : vector<4x32xf32> to vector<1x32xf32>
    %147 = vector.shape_cast %146 : vector<1x32xf32> to vector<32xf32>
    %148 = vector.extract_strided_slice %137 {offsets = [3, 0], sizes = [1, 32], strides = [1, 1]} : vector<4x32xf32> to vector<1x32xf32>
    %149 = vector.shape_cast %148 : vector<1x32xf32> to vector<32xf32>
    %150 = arith.maximumf %147, %149 : vector<32xf32>
    %c46 = arith.constant 46 : index
    %c0_51 = arith.constant 0 : index
    %151 = vector.load %arg6[%c46, %c0_51] : memref<64x32xf32, #tpu.memory_space<vmem>>, vector<1x32xf32>
    %152 = vector.shape_cast %151 : vector<1x32xf32> to vector<32xf32>
    %153 = vector.shape_cast %150 : vector<32xf32> to vector<1x32xf32>
    tpu.vector_store %arg6[%c46, %c0_51], %153 {strides = array<i32>} : memref<64x32xf32, #tpu.memory_space<vmem>>, vector<1x32xf32>,
    %c103 = arith.constant 103 : index
    %c0_52 = arith.constant 0 : index
    %154 = vector.load %arg5[%c103, %c0_52] : memref<120x32xf32, #tpu.memory_space<vmem>>, vector<4x32xf32>
    %c109 = arith.constant 109 : index
    %c0_53 = arith.constant 0 : index
    %155 = vector.load %arg5[%c109, %c0_53] : memref<120x32xf32, #tpu.memory_space<vmem>>, vector<4x32xf32>
    %156 = arith.maximumf %154, %155 : vector<4x32xf32>
    %157 = vector.extract_strided_slice %156 {offsets = [0, 0], sizes = [1, 32], strides = [1, 1]} : vector<4x32xf32> to vector<1x32xf32>
    %158 = vector.shape_cast %157 : vector<1x32xf32> to vector<32xf32>
    %159 = vector.extract_strided_slice %156 {offsets = [1, 0], sizes = [1, 32], strides = [1, 1]} : vector<4x32xf32> to vector<1x32xf32>
    %160 = vector.shape_cast %159 : vector<1x32xf32> to vector<32xf32>
    %161 = arith.maximumf %158, %160 : vector<32xf32>
    %c49_54 = arith.constant 49 : index
    %c0_55 = arith.constant 0 : index
    %162 = vector.load %arg6[%c49_54, %c0_55] : memref<64x32xf32, #tpu.memory_space<vmem>>, vector<1x32xf32>
    %163 = vector.shape_cast %162 : vector<1x32xf32> to vector<32xf32>
    %164 = vector.shape_cast %161 : vector<32xf32> to vector<1x32xf32>
    tpu.vector_store %arg6[%c49_54, %c0_55], %164 {strides = array<i32>} : memref<64x32xf32, #tpu.memory_space<vmem>>, vector<1x32xf32>,
    %165 = vector.extract_strided_slice %156 {offsets = [2, 0], sizes = [1, 32], strides = [1, 1]} : vector<4x32xf32> to vector<1x32xf32>
    %166 = vector.shape_cast %165 : vector<1x32xf32> to vector<32xf32>
    %167 = vector.extract_strided_slice %156 {offsets = [3, 0], sizes = [1, 32], strides = [1, 1]} : vector<4x32xf32> to vector<1x32xf32>
    %168 = vector.shape_cast %167 : vector<1x32xf32> to vector<32xf32>
    %169 = arith.maximumf %166, %168 : vector<32xf32>
    %c50 = arith.constant 50 : index
    %c0_56 = arith.constant 0 : index
    %170 = vector.load %arg6[%c50, %c0_56] : memref<64x32xf32, #tpu.memory_space<vmem>>, vector<1x32xf32>
    %171 = vector.shape_cast %170 : vector<1x32xf32> to vector<32xf32>
    %172 = vector.shape_cast %169 : vector<32xf32> to vector<1x32xf32>
    tpu.vector_store %arg6[%c50, %c0_56], %172 {strides = array<i32>} : memref<64x32xf32, #tpu.memory_space<vmem>>, vector<1x32xf32>,
    %c3_57 = arith.constant 3 : index
    %c0_58 = arith.constant 0 : index
    %173 = vector.load %arg6[%c3_57, %c0_58] : memref<64x32xf32, #tpu.memory_space<vmem>>, vector<48x32xf32>
    %c4 = arith.constant 4 : index
    %c0_59 = arith.constant 0 : index
    %174 = vector.load %arg6[%c4, %c0_59] : memref<64x32xf32, #tpu.memory_space<vmem>>, vector<48x32xf32>
    %c5 = arith.constant 5 : index
    %c0_60 = arith.constant 0 : index
    %175 = vector.load %arg6[%c5, %c0_60] : memref<64x32xf32, #tpu.memory_space<vmem>>, vector<48x32xf32>
    %c7_61 = arith.constant 7 : index
    %c0_62 = arith.constant 0 : index
    %176 = vector.load %arg6[%c7_61, %c0_62] : memref<64x32xf32, #tpu.memory_space<vmem>>, vector<48x32xf32>
    %c8_63 = arith.constant 8 : index
    %c0_64 = arith.constant 0 : index
    %177 = vector.load %arg6[%c8_63, %c0_64] : memref<64x32xf32, #tpu.memory_space<vmem>>, vector<48x32xf32>
    %c9_65 = arith.constant 9 : index
    %c0_66 = arith.constant 0 : index
    %178 = vector.load %arg6[%c9_65, %c0_66] : memref<64x32xf32, #tpu.memory_space<vmem>>, vector<48x32xf32>
    %c11 = arith.constant 11 : index
    %c0_67 = arith.constant 0 : index
    %179 = vector.load %arg6[%c11, %c0_67] : memref<64x32xf32, #tpu.memory_space<vmem>>, vector<48x32xf32>
    %c12 = arith.constant 12 : index
    %c0_68 = arith.constant 0 : index
    %180 = vector.load %arg6[%c12, %c0_68] : memref<64x32xf32, #tpu.memory_space<vmem>>, vector<48x32xf32>
    %c13_69 = arith.constant 13 : index
    %c0_70 = arith.constant 0 : index
    %181 = vector.load %arg6[%c13_69, %c0_70] : memref<64x32xf32, #tpu.memory_space<vmem>>, vector<48x32xf32>
    %182 = tpu.concatenate %173, %174, %175, %176, %177, %178, %179, %180, %181 in 1 : vector<48x32xf32>, vector<48x32xf32>, vector<48x32xf32>, vector<48x32xf32>, vector<48x32xf32>, vector<48x32xf32>, vector<48x32xf32>, vector<48x32xf32>, vector<48x32xf32> -> vector<48x288xf32>
    %183 = arith.truncf %182 : vector<48x288xf32> to vector<48x288xbf16>
    %c80 = arith.constant 80 : index
    %c0_71 = arith.constant 0 : index
    %184 = vector.load %arg2[%c80, %c0_71] : memref<496x128xbf16, #tpu.memory_space<vmem>>, vector<288x64xbf16>
    %cst_72 = arith.constant dense<0.000000e+00> : vector<48x64xf32>
    %185 = tpu.matmul %183, %184, %cst_72 {dimension_numbers = #tpu.dot_dimension_numbers<[1], [0], [0], [1], [0, 0, 1, 1], [], []>} : vector<48x288xbf16>, vector<288x64xbf16>, vector<48x64xf32> -> vector<48x64xf32>
    %c1_73 = arith.constant 1 : index
    %c0_74 = arith.constant 0 : index
    %186 = vector.load %arg3[%c1_73, %c0_74] : memref<3x128xf32, #tpu.memory_space<vmem>>, vector<1x64xf32>
    %187 = vector.broadcast %186 : vector<1x64xf32> to vector<48x64xf32>
    %188 = arith.addf %185, %187 : vector<48x64xf32>
    %cst_75 = arith.constant 0.000000e+00 : f32
    %189 = vector.broadcast %cst_75 : f32 to vector<48x64xf32>
    %190 = arith.maximumf %188, %189 : vector<48x64xf32>
    %c0_76 = arith.constant 0 : index
    %c0_77 = arith.constant 0 : index
    %191 = vector.load %arg7[%c0_76, %c0_77] : memref<48x64xf32, #tpu.memory_space<vmem>>, vector<48x64xf32>
    tpu.vector_store %arg7[%c0_76, %c0_77], %190 {strides = array<i32>} : memref<48x64xf32, #tpu.memory_space<vmem>>, vector<48x64xf32>,
    %cst_78 = arith.constant 0.000000e+00 : f32
    %192 = vector.broadcast %cst_78 : f32 to vector<8x128xf32>
    %c0_79 = arith.constant 0 : index
    %c0_80 = arith.constant 0 : index
    %193 = vector.load %arg8[%c0_79, %c0_80] : memref<8x128xf32, #tpu.memory_space<vmem>>, vector<8x128xf32>
    tpu.vector_store %arg8[%c0_79, %c0_80], %192 {strides = array<i32>} : memref<8x128xf32, #tpu.memory_space<vmem>>, vector<8x128xf32>,
    %c5_81 = arith.constant 5 : index
    %c0_82 = arith.constant 0 : index
    %194 = vector.load %arg7[%c5_81, %c0_82] : memref<48x64xf32, #tpu.memory_space<vmem>>, vector<2x64xf32>
    %c9_83 = arith.constant 9 : index
    %c0_84 = arith.constant 0 : index
    %195 = vector.load %arg7[%c9_83, %c0_84] : memref<48x64xf32, #tpu.memory_space<vmem>>, vector<2x64xf32>
    %196 = arith.maximumf %194, %195 : vector<2x64xf32>
    %197 = vector.extract_strided_slice %196 {offsets = [0, 0], sizes = [1, 64], strides = [1, 1]} : vector<2x64xf32> to vector<1x64xf32>
    %198 = vector.shape_cast %197 : vector<1x64xf32> to vector<64xf32>
    %199 = vector.extract_strided_slice %196 {offsets = [1, 0], sizes = [1, 64], strides = [1, 1]} : vector<2x64xf32> to vector<1x64xf32>
    %200 = vector.shape_cast %199 : vector<1x64xf32> to vector<64xf32>
    %201 = arith.maximumf %198, %200 : vector<64xf32>
    %c13_85 = arith.constant 13 : index
    %c0_86 = arith.constant 0 : index
    %202 = vector.load %arg7[%c13_85, %c0_86] : memref<48x64xf32, #tpu.memory_space<vmem>>, vector<2x64xf32>
    %c17_87 = arith.constant 17 : index
    %c0_88 = arith.constant 0 : index
    %203 = vector.load %arg7[%c17_87, %c0_88] : memref<48x64xf32, #tpu.memory_space<vmem>>, vector<2x64xf32>
    %204 = arith.maximumf %202, %203 : vector<2x64xf32>
    %205 = vector.extract_strided_slice %204 {offsets = [0, 0], sizes = [1, 64], strides = [1, 1]} : vector<2x64xf32> to vector<1x64xf32>
    %206 = vector.shape_cast %205 : vector<1x64xf32> to vector<64xf32>
    %207 = vector.extract_strided_slice %204 {offsets = [1, 0], sizes = [1, 64], strides = [1, 1]} : vector<2x64xf32> to vector<1x64xf32>
    %208 = vector.shape_cast %207 : vector<1x64xf32> to vector<64xf32>
    %209 = arith.maximumf %206, %208 : vector<64xf32>
    %210 = tpu.concatenate %201, %209 in 0 : vector<64xf32>, vector<64xf32> -> vector<128xf32>
    %c0_89 = arith.constant 0 : index
    %c0_90 = arith.constant 0 : index
    %211 = vector.load %arg8[%c0_89, %c0_90] : memref<8x128xf32, #tpu.memory_space<vmem>>, vector<1x128xf32>
    %212 = vector.shape_cast %211 : vector<1x128xf32> to vector<128xf32>
    %213 = vector.shape_cast %210 : vector<128xf32> to vector<1x128xf32>
    tpu.vector_store %arg8[%c0_89, %c0_90], %213 {strides = array<i32>} : memref<8x128xf32, #tpu.memory_space<vmem>>, vector<1x128xf32>,
    %c29 = arith.constant 29 : index
    %c0_91 = arith.constant 0 : index
    %214 = vector.load %arg7[%c29, %c0_91] : memref<48x64xf32, #tpu.memory_space<vmem>>, vector<2x64xf32>
    %c33 = arith.constant 33 : index
    %c0_92 = arith.constant 0 : index
    %215 = vector.load %arg7[%c33, %c0_92] : memref<48x64xf32, #tpu.memory_space<vmem>>, vector<2x64xf32>
    %216 = arith.maximumf %214, %215 : vector<2x64xf32>
    %217 = vector.extract_strided_slice %216 {offsets = [0, 0], sizes = [1, 64], strides = [1, 1]} : vector<2x64xf32> to vector<1x64xf32>
    %218 = vector.shape_cast %217 : vector<1x64xf32> to vector<64xf32>
    %219 = vector.extract_strided_slice %216 {offsets = [1, 0], sizes = [1, 64], strides = [1, 1]} : vector<2x64xf32> to vector<1x64xf32>
    %220 = vector.shape_cast %219 : vector<1x64xf32> to vector<64xf32>
    %221 = arith.maximumf %218, %220 : vector<64xf32>
    %c37_93 = arith.constant 37 : index
    %c0_94 = arith.constant 0 : index
    %222 = vector.load %arg7[%c37_93, %c0_94] : memref<48x64xf32, #tpu.memory_space<vmem>>, vector<2x64xf32>
    %c41_95 = arith.constant 41 : index
    %c0_96 = arith.constant 0 : index
    %223 = vector.load %arg7[%c41_95, %c0_96] : memref<48x64xf32, #tpu.memory_space<vmem>>, vector<2x64xf32>
    %224 = arith.maximumf %222, %223 : vector<2x64xf32>
    %225 = vector.extract_strided_slice %224 {offsets = [0, 0], sizes = [1, 64], strides = [1, 1]} : vector<2x64xf32> to vector<1x64xf32>
    %226 = vector.shape_cast %225 : vector<1x64xf32> to vector<64xf32>
    %227 = vector.extract_strided_slice %224 {offsets = [1, 0], sizes = [1, 64], strides = [1, 1]} : vector<2x64xf32> to vector<1x64xf32>
    %228 = vector.shape_cast %227 : vector<1x64xf32> to vector<64xf32>
    %229 = arith.maximumf %226, %228 : vector<64xf32>
    %230 = tpu.concatenate %221, %229 in 0 : vector<64xf32>, vector<64xf32> -> vector<128xf32>
    %c1_97 = arith.constant 1 : index
    %c0_98 = arith.constant 0 : index
    %231 = vector.load %arg8[%c1_97, %c0_98] : memref<8x128xf32, #tpu.memory_space<vmem>>, vector<1x128xf32>
    %232 = vector.shape_cast %231 : vector<1x128xf32> to vector<128xf32>
    %233 = vector.shape_cast %230 : vector<128xf32> to vector<1x128xf32>
    tpu.vector_store %arg8[%c1_97, %c0_98], %233 {strides = array<i32>} : memref<8x128xf32, #tpu.memory_space<vmem>>, vector<1x128xf32>,
    %c0_99 = arith.constant 0 : index
    %c0_100 = arith.constant 0 : index
    %234 = vector.load %arg8[%c0_99, %c0_100] : memref<8x128xf32, #tpu.memory_space<vmem>>, vector<8x128xf32>
    %235 = arith.truncf %234 : vector<8x128xf32> to vector<8x128xbf16>
    %c368 = arith.constant 368 : index
    %c0_101 = arith.constant 0 : index
    %236 = vector.load %arg2[%c368, %c0_101] : memref<496x128xbf16, #tpu.memory_space<vmem>>, vector<128x128xbf16>
    %cst_102 = arith.constant dense<0.000000e+00> : vector<8x128xf32>
    %237 = tpu.matmul %235, %236, %cst_102 {dimension_numbers = #tpu.dot_dimension_numbers<[1], [0], [0], [1], [0, 0, 1, 1], [], []>} : vector<8x128xbf16>, vector<128x128xbf16>, vector<8x128xf32> -> vector<8x128xf32>
    %c2_103 = arith.constant 2 : index
    %c0_104 = arith.constant 0 : index
    %238 = vector.load %arg3[%c2_103, %c0_104] : memref<3x128xf32, #tpu.memory_space<vmem>>, vector<1x128xf32>
    %239 = vector.broadcast %238 : vector<1x128xf32> to vector<8x128xf32>
    %240 = arith.addf %237, %239 : vector<8x128xf32>
    %c0_105 = arith.constant 0 : index
    %c0_106 = arith.constant 0 : index
    %241 = vector.load %arg4[%c0_105, %c0_106] : memref<8x128xf32, #tpu.memory_space<vmem>>, vector<8x128xf32>
    tpu.vector_store %arg4[%c0_105, %c0_106], %240 {strides = array<i32>} : memref<8x128xf32, #tpu.memory_space<vmem>>, vector<8x128xf32>,
    return
  }
  func.func @transform_0(%arg0: i32) -> (i32, i32) {
    %c0_i32 = arith.constant 0 : i32
    %c0_i32_0 = arith.constant 0 : i32
    %c0_i32_1 = arith.constant 0 : i32
    return %c0_i32, %c0_i32_0 : i32, i32
  }
  func.func @transform_1(%arg0: i32) -> (i32, i32) {
    %c0_i32 = arith.constant 0 : i32
    %c0_i32_0 = arith.constant 0 : i32
    %c0_i32_1 = arith.constant 0 : i32
    return %c0_i32, %c0_i32_0 : i32, i32
  }
  func.func @transform_2(%arg0: i32) -> (i32, i32) {
    %c0_i32 = arith.constant 0 : i32
    %c0_i32_0 = arith.constant 0 : i32
    %c0_i32_1 = arith.constant 0 : i32
    return %c0_i32, %c0_i32_0 : i32, i32
  }
  func.func @transform_3(%arg0: i32) -> (i32, i32) {
    %c0_i32 = arith.constant 0 : i32
    %c0_i32_0 = arith.constant 0 : i32
    %c0_i32_1 = arith.constant 0 : i32
    return %c0_i32, %c0_i32_0 : i32, i32
  }
}

</mosaic_0001>

<bundles_post_ra>
// kernel: forward.1
= control target key start
LH: loop header
LB: loop body
LE: loop exit
PB: predicated region body
PF: predicated region fallthrough
CT: control target
= control target key end

     0   :  { %s2099_s20 = smov 24   ;;  %s2100_s21 = smov 8   ;;  %vm787_vm0 = vcmask 1043456   ;;  %vm588_vm1 = vcmask 64512   ;;  %vm604_vm2 = vcmask 130048   ;;  %vm620_vm3 = vcmask 195584   ;;  %s3014_s0 = inlined_call_operand.vmem [shape: f32[136,8], index: 0, kind: input, shape index: {}]   ;;  %s3015_s1 = inlined_call_operand.vmem [shape: bf16[496,128], index: 1, kind: input, shape index: {}]   ;;  %s3016_s2 = inlined_call_operand.vmem [shape: f32[3,128], index: 2, kind: input, shape index: {}]   ;;  %s3017_s3 = inlined_call_operand.vmem [shape: f32[8,128], index: 3, kind: output, shape index: {}]  }
   0x1   :  { %v61_v0 = vld [vmem:[%s3014_s0 + $0xf] sm:$0xff]  ;;  %v60_v1 = vld [vmem:[%s3014_s0 + $0x7] sm:$0xff]  ;;  %s2101_s7 = smov 40   ;;  %s2102_s12 = smov 32   ;;  %v62_v17 = vld [vmem:[%s3014_s0 + $0x17] sm:$0xff]  ;;  %vm636_vm4 = vcmask 261120  }
   0x2   :  { %v1736_v2 = vpack.i.bf16 %v61_v0, %v60_v1  ;;  %v30_v3 = vld [vmem:[%s3014_s0 + $0x2] sm:$0xff]  ;;  %v31_v4 = vld [vmem:[%s3014_s0 + $0xa] sm:$0xff]  ;;  %v92_v16 = vld [vmem:[%s3014_s0 + $0x15] sm:$0xff]  ;;  %s2103_s15 = smov 16   ;;  %v1761_v21 = vpack.i.bf16 %v62_v17, %v61_v0  ;;  %s2104_s22 = smov 48   ;;  %vm652_vm5 = vcmask 326656  }
   0x3   :  { %v1726_v5 = vpack.i.bf16 %v31_v4, %v30_v3  ;;  %v75_v6 = vld [vmem:[%s3014_s0 + $0x8] sm:$0xff]  ;;  %v76_v7 = vld [vmem:[%s3014_s0 + $0x10] sm:$0xff]  ;;  %v33_v24 = vld [vmem:[%s3014_s0 + $0x1a] sm:$0xff]  ;;  %s2105_s27 = smov 64   ;;  %s2106_s28 = smov 56   ;;  %vm668_vm6 = vcmask 392192  }
   0x4   :  { %1737 = vrot.lane.b32.xlu1 %v1736_v2, %s2099_s20  ;;  %v2152_v8 = vld [vmem:[%s3014_s0 + $0x9] sm:$0xff]  ;;  %v2163_v11 = vld [vmem:[%s3014_s0 + $0x11] sm:$0xff]  ;;  %v1741_v13 = vpack.i.bf16 %v76_v7, %v75_v6  ;;  %v63_v25 = vld [vmem:[%s3014_s0 + $0x1f] sm:$0xff]  ;;  %vm684_vm7 = vcmask 457728   ;;  %vm700_vm8 = vcmask 523264   ;;  %vm762_vm9 = vcmask 588800  }
   0x5   :  { %1727 = vrot.lane.b32.xlu0 %v1726_v5, %s2100_s21  ;;  %v45_v9 = vld [vmem:[%s3014_s0 + $0x3] sm:$0xff]  ;;  %v46_v10 = vld [vmem:[%s3014_s0 + $0xb] sm:$0xff]  ;;  %v1746_v12 = vpack.i.bf16 %v2163_v11, %v2152_v8  ;;  %v107_v20 = vld [vmem:[%s3014_s0 + $0x16] sm:$0xff]  ;;  %v1776_v29 = vpack.i.bf16 %v63_v25, %v62_v17  ;;  %vm884_vm10 = vcmask 253952   ;;  %vm886_vm11 = vcmask 256002  }
   0x6   :  { %v1731_v14 = vpack.i.bf16 %v46_v10, %v45_v9  ;;  %v91_v15 = vld [vmem:[%s3014_s0 + $0xd] sm:$0xff]  ;;  %v48_v28 = vld [vmem:[%s3014_s0 + $0x1b] sm:$0xff]  ;;  %v94_v34 = vld [vmem:[%s3014_s0 + $0x25] sm:$0xff]  ;;  %vm1141_vm12 = vcmask 785408  }
   0x7   :  { %1747 = vrot.lane.b32.xlu2 %v1746_v12, %s2101_s7  ;;  %v1751_v18 = vpack.i.bf16 %v92_v16, %v91_v15  ;;  %v106_v19 = vld [vmem:[%s3014_s0 + $0xe] sm:$0xff]  ;;  %v77_v31 = vld [vmem:[%s3014_s0 + $0x18] sm:$0xff]  ;;  %v78_v32 = vld [vmem:[%s3014_s0 + $0x20] sm:$0xff] }
   0x8   :  { %v1756_v22 = vpack.i.bf16 %v107_v20, %v106_v19  ;;  %v32_v23 = vld [vmem:[%s3014_s0 + $0x12] sm:$0xff]  ;;  %v93_v33 = vld [vmem:[%s3014_s0 + $0x1d] sm:$0xff]  ;;  %v1781_v35 = vpack.i.bf16 %v78_v32, %v77_v31  ;;  %v109_v41 = vld [vmem:[%s3014_s0 + $0x26] sm:$0xff] }
   0x9   :  { %v1766_v26 = vpack.i.bf16 %v33_v24, %v32_v23  ;;  %v47_v27 = vld [vmem:[%s3014_s0 + $0x13] sm:$0xff]  ;;  %v2226_v37 = vld [vmem:[%s3014_s0 + $0x21] sm:$0xff]  ;;  %v1791_v38 = vpack.i.bf16 %v94_v34, %v93_v33  ;;  %v35_v43 = vld [vmem:[%s3014_s0 + $0x2a] sm:$0xff] }
   0xa   :  { %v1771_v30 = vpack.i.bf16 %v48_v28, %v47_v27  ;;  %v2221_v36 = vld [vmem:[%s3014_s0 + $0x19] sm:$0xff]  ;;  %v34_v42 = vld [vmem:[%s3014_s0 + $0x22] sm:$0xff]  ;;  %v50_v49 = vld [vmem:[%s3014_s0 + $0x2b] sm:$0xff] }
   0xb   :  { %v1786_v39 = vpack.i.bf16 %v2226_v37, %v2221_v36  ;;  %v108_v40 = vld [vmem:[%s3014_s0 + $0x1e] sm:$0xff]  ;;  %v64_v45 = vld [vmem:[%s3014_s0 + $0x27] sm:$0xff]  ;;  %v1806_v46 = vpack.i.bf16 %v35_v43, %v34_v42  ;;  %v80_v51 = vld [vmem:[%s3014_s0 + $0x30] sm:$0xff] }
   0xc   :  { %1742 = vrot.lane.b32.xlu1 %v1741_v13, %s2102_s12  ;;  %v1796_v44 = vpack.i.bf16 %v109_v41, %v108_v40  ;;  %v1801_v47 = vpack.i.bf16 %v64_v45, %v63_v25  ;;  %v49_v48 = vld [vmem:[%s3014_s0 + $0x23] sm:$0xff]  ;;  %v65_v53 = vld [vmem:[%s3014_s0 + $0x2f] sm:$0xff]  ;;  %v66_v1 = vld [vmem:[%s3014_s0 + $0x37] sm:$0xff] }
   0xd   :  { %1732 = vrot.lane.b32.xlu0 %v1731_v14, %s2103_s15  ;;  %v79_v50 = vld [vmem:[%s3014_s0 + $0x28] sm:$0xff]  ;;  %v1811_v52 = vpack.i.bf16 %v50_v49, %v49_v48  ;;  %v1816_v55 = vpack.i.bf16 %v65_v53, %v64_v45  ;;  %v2275_v57 = vld [vmem:[%s3014_s0 + $0x31] sm:$0xff]  ;;  %v52_v3 = vld [vmem:[%s3014_s0 + $0x3b] sm:$0xff]  ;;  %v1841_v4 = vpack.i.bf16 %v66_v1, %v65_v53 }
   0xe   :  { %v1821_v54 = vpack.i.bf16 %v80_v51, %v79_v50  ;;  %v2270_v56 = vld [vmem:[%s3014_s0 + $0x29] sm:$0xff]  ;;  %v111_v59 = vld [vmem:[%s3014_s0 + $0x36] sm:$0xff]  ;;  %v67_v10 = vld [vmem:[%s3014_s0 + $0x3f] sm:$0xff] }
   0xf   :  { %1752 = vrot.lane.b32.xlu2 %v1751_v18, %s2104_s22  ;;  %v110_v58 = vld [vmem:[%s3014_s0 + $0x2e] sm:$0xff]  ;;  %v1826_v60 = vpack.i.bf16 %v2275_v57, %v2270_v56  ;;  %v37_v6 = vld [vmem:[%s3014_s0 + $0x3a] sm:$0xff]  ;;  %v1856_v14 = vpack.i.bf16 %v67_v10, %v66_v1  ;;  %v98_v20 = vld [vmem:[%s3014_s0 + $0x45] sm:$0xff] }
  0x10   :  { %v95_v61 = vld [vmem:[%s3014_s0 + $0x2d] sm:$0xff]  ;;  %v96_v62 = vld [vmem:[%s3014_s0 + $0x35] sm:$0xff]  ;;  %v1836_v63 = vpack.i.bf16 %v111_v59, %v110_v58  ;;  %v2325_v13 = vld [vmem:[%s3014_s0 + $0x41] sm:$0xff] }
  0x11   :  { %v1831_v0 = vpack.i.bf16 %v96_v62, %v95_v61  ;;  %v51_v2 = vld [vmem:[%s3014_s0 + $0x33] sm:$0xff]  ;;  %v82_v16 = vld [vmem:[%s3014_s0 + $0x40] sm:$0xff]  ;;  %v39_v28 = vld [vmem:[%s3014_s0 + $0x4a] sm:$0xff] }
  0x12   :  { %v36_v5 = vld [vmem:[%s3014_s0 + $0x32] sm:$0xff]  ;;  %v1851_v7 = vpack.i.bf16 %v52_v3, %v51_v2  ;;  %v97_v19 = vld [vmem:[%s3014_s0 + $0x3d] sm:$0xff]  ;;  %v113_v24 = vld [vmem:[%s3014_s0 + $0x46] sm:$0xff] }
  0x13   :  { %v1846_v9 = vpack.i.bf16 %v37_v6, %v36_v5  ;;  %v2320_v12 = vld [vmem:[%s3014_s0 + $0x39] sm:$0xff]  ;;  %v38_v27 = vld [vmem:[%s3014_s0 + $0x42] sm:$0xff]  ;;  %v69_v48 = vld [vmem:[%s3014_s0 + $0x4f] sm:$0xff] }
  0x14   :  { %1762 = vrot.lane.b32.xlu1 %v1761_v21, %s2105_s27  ;;  %v81_v15 = vld [vmem:[%s3014_s0 + $0x38] sm:$0xff]  ;;  %v1866_v17 = vpack.i.bf16 %v2325_v13, %v2320_v12  ;;  %v68_v21 = vld [vmem:[%s3014_s0 + $0x47] sm:$0xff]  ;;  %v1886_v31 = vpack.i.bf16 %v39_v28, %v38_v27  ;;  %v732_v32 = vld [vmem:[%s3015_s1 + $0x20] sm:$0xf] }
  0x15   :  { %1757 = vrot.lane.b32.xlu0 %v1756_v22, %s2106_s28  ;;  %v1861_v18 = vpack.i.bf16 %v82_v16, %v81_v15  ;;  %v1871_v22 = vpack.i.bf16 %v98_v20, %v97_v19  ;;  %v112_v23 = vld [vmem:[%s3014_s0 + $0x3e] sm:$0xff]  ;;  %v1881_v25 = vpack.i.bf16 %v68_v21, %v67_v10  ;;  %v40_v33 = vld [vmem:[%s3014_s0 + $0x52] sm:$0xff]  ;;  %v1906_v50 = vpack.i.bf16 %v69_v48, %v68_v21 }
  0x16   :  { %v41_v34 = vld [vmem:[%s3014_s0 + $0x5a] sm:$0xff]  ;;  %v1678_v51 = vld [vmem:[%s3015_s1 + $0x10] sm:$0xff]  ;;  %v102_v6 = vld [vmem:[%s3014_s0 + $0x65] sm:$0xff] }
  0x17   :  { %1767 = vrot.lane.b32.xlu2 %v1766_v26, %s2100_s21  ;;  %v1876_v26 = vpack.i.bf16 %v113_v24, %v112_v23  ;;  %v1891_v40 = vpack.i.bf16 %v41_v34, %v40_v33  ;;  %v55_v41 = vld [vmem:[%s3014_s0 + $0x53] sm:$0xff]  ;;  %v56_v42 = vld [vmem:[%s3014_s0 + $0x5b] sm:$0xff]  ;;  %v58_v27 = vld [vmem:[%s3014_s0 + $0x6b] sm:$0xff] }
  0x18   :  { %v2394_v45 = vld [vmem:[%s3014_s0 + $0x5f] sm:$0xff]  ;;  %v84_v53 = vld [vmem:[%s3014_s0 + $0x50] sm:$0xff] }
  0x19   :  { %v2426_v58 = vld [vmem:[%s3014_s0 + $0x51] sm:$0xff]  ;;  %v86_v62 = vld [vmem:[%s3014_s0 + $0x60] sm:$0xff] }
  0x1a   :  { %v85_v61 = vld [vmem:[%s3014_s0 + $0x58] sm:$0xff]  ;;  %v1676_v1 = vld [vmem:[%s3015_s1] sm:$0xff]  ;;  %v114_v16 = vld [vmem:[%s3014_s0 + $0x4e] sm:$0xff] }
  0x1b   :  { %v2446_v2 = vld [vmem:[%s3014_s0 + $0x59] sm:$0xff]  ;;  %v2451_v3 = vld [vmem:[%s3014_s0 + $0x61] sm:$0xff] }
  0x1c   :  { %1777 = vrot.lane.b32.xlu1 %v1776_v29, %s2099_s20  ;;  %v53_v29 = vld [vmem:[%s3014_s0 + $0x43] sm:$0xff]  ;;  %v100_v10 = vld [vmem:[%s3014_s0 + $0x55] sm:$0xff] }
  0x1d   :  { %1772 = vrot.lane.b32.xlu0 %v1771_v30, %s2103_s15  ;;  %v54_v30 = vld [vmem:[%s3014_s0 + $0x4b] sm:$0xff]  ;;  %v101_v5 = vld [vmem:[%s3014_s0 + $0x5d] sm:$0xff] }
  0x1e   :  { %v116_v21 = vld [vmem:[%s3014_s0 + $0x5e] sm:$0xff] }
  0x1f   :  { %1782 = vrot.lane.b32.xlu2 %v1781_v35, %s2102_s12  ;;  %v752_v35 = vunpack.c.l.b16 %v732_v32 }
  0x24   :  { %1792 = vrot.lane.b32.xlu1 %v1791_v38, %s2104_s22  ;;  %v1896_v38 = vpack.i.bf16 %v54_v30, %v53_v29  ;;  %v42_v29 = vld [vmem:[%s3014_s0 + $0x62] sm:$0xff]  ;;  %v43_v30 = vld [vmem:[%s3014_s0 + $0x6a] sm:$0xff] }
  0x25   :  { %1787 = vrot.lane.b32.xlu0 %v1786_v39, %s2101_s7  ;;  %v757_v39 = vpack.c.b16 %v752_v35, %v752_v35  ;;  %v15_v35 = vld [vmem:[%s3014_s0 + $0x1] sm:$0xff] }
  0x27   :  { %1797 = vrot.lane.b32.xlu2 %v1796_v44, %s2106_s28  ;;  %v789_v43 = vsel %vm787_vm0, %v757_v39, 0  ;;  %v2389_v44 = vld [vmem:[%s3014_s0 + $0x57] sm:$0xff] }
  0x28   :  { %794 = vmatpush.bf16.msra.mxu0 %v789_v43  ;;  %1706 = vmatpush.bf16.msra.mxu1 %v789_v43  ;;  %v1911_v49 = vpack.i.bf16 %v2394_v45, %v2389_v44  ;;  %v1956_v24 = vpack.i.bf16 %v2389_v44, %v69_v48 }
  0x29   :  { %1707 = vmatpush.bf16.msra.mxu3 %v789_v43 }
  0x2c   :  { %1807 = vrot.lane.b32.xlu1 %v1806_v46, %s2100_s21  ;;  %v1901_v46 = vpack.i.bf16 %v56_v42, %v55_v41  ;;  %v1966_v41 = vpack.i.bf16 %v43_v30, %v42_v29 }
  0x2d   :  { %1802 = vrot.lane.b32.xlu0 %v1801_v47, %s2105_s27  ;;  %v1679_v47 = vld [vmem:[%s3015_s1 + $0x18] sm:$0xff] }
  0x2e   :  { %795 = vmatpush.bf16.msra.mxu0 %v1679_v47  ;;  %1708 = vmatpush.bf16.msra.mxu1 %v1679_v47 }
  0x2f   :  { %1812 = vrot.lane.b32.xlu2 %v1811_v52, %s2103_s15  ;;  %1709 = vmatpush.bf16.msra.mxu3 %v1679_v47  ;;  %v83_v52 = vld [vmem:[%s3014_s0 + $0x48] sm:$0xff] }
  0x30   :  { %v1916_v59 = vpack.i.bf16 %v84_v53, %v83_v52 }
  0x32   :  { %796 = vmatpush.bf16.msra.mxu0 %v1678_v51  ;;  %1710 = vmatpush.bf16.msra.mxu1 %v1678_v51 }
  0x33   :  { %1711 = vmatpush.bf16.msra.mxu3 %v1678_v51 }
  0x34   :  { %1822 = vrot.lane.b32.xlu1 %v1821_v54, %s2102_s12 }
  0x35   :  { %1817 = vrot.lane.b32.xlu0 %v1816_v55, %s2099_s20  ;;  %v2421_v55 = vld [vmem:[%s3014_s0 + $0x49] sm:$0xff] }
  0x37   :  { %1827 = vrot.lane.b32.xlu2 %v1826_v60, %s2101_s7  ;;  %v1677_v60 = vld [vmem:[%s3015_s1 + $0x8] sm:$0xff] }
  0x38   :  { %797 = vmatpush.bf16.msra.mxu0 %v1677_v60  ;;  %1712 = vmatpush.bf16.msra.mxu1 %v1677_v60 }
  0x39   :  { %1713 = vmatpush.bf16.msra.mxu3 %v1677_v60 }
  0x3c   :  { %1837 = vrot.lane.b32.xlu1 %v1836_v63, %s2106_s28  ;;  %v1926_v63 = vpack.i.bf16 %v2426_v58, %v2421_v55  ;;  %798 = vmatpush.bf16.msra.mxu0 %v1676_v1 }
  0x3d   :  { %1832 = vrot.lane.b32.xlu0 %v1831_v0, %s2104_s22  ;;  %v1921_v0 = vpack.i.bf16 %v86_v62, %v85_v61  ;;  %1714 = vmatpush.bf16.msra.mxu1 %v1676_v1 }
  0x3e   :  { %1715 = vmatpush.bf16.msra.mxu3 %v1676_v1 }
  0x3f   :  { %1842 = vrot.lane.b32.xlu2 %v1841_v4, %s2105_s27 }
  0x44   :  { %1852 = vrot.lane.b32.xlu1 %v1851_v7, %s2103_s15  ;;  %v1931_v7 = vpack.i.bf16 %v2451_v3, %v2446_v2 }
  0x45   :  { %1847 = vrot.lane.b32.xlu0 %v1846_v9, %s2100_s21  ;;  %v99_v9 = vld [vmem:[%s3014_s0 + $0x4d] sm:$0xff] }
  0x46   :  { %v1936_v15 = vpack.i.bf16 %v100_v10, %v99_v9 }
  0x47   :  { %1857 = vrot.lane.b32.xlu2 %v1856_v14, %s2099_s20  ;;  %v1941_v14 = vpack.i.bf16 %v102_v6, %v101_v5 }
  0x4c   :  { %1867 = vrot.lane.b32.xlu1 %v1866_v17, %s2101_s7  ;;  %v115_v17 = vld [vmem:[%s3014_s0 + $0x56] sm:$0xff] }
  0x4d   :  { %1862 = vrot.lane.b32.xlu0 %v1861_v18, %s2102_s12  ;;  %v1946_v19 = vpack.i.bf16 %v115_v17, %v114_v16 }
  0x4f   :  { %1872 = vrot.lane.b32.xlu2 %v1871_v22, %s2104_s22  ;;  %v117_v22 = vld [vmem:[%s3014_s0 + $0x66] sm:$0xff] }
  0x54   :  { %1882 = vrot.lane.b32.xlu1 %v1881_v25, %s2105_s27  ;;  %v1951_v25 = vpack.i.bf16 %v117_v22, %v116_v21  ;;  %v87_v21 = vld [vmem:[%s3014_s0 + $0x68] sm:$0xff]  ;;  %v88_v22 = vld [vmem:[%s3014_s0 + $0x70] sm:$0xff] }
  0x55   :  { %1877 = vrot.lane.b32.xlu0 %v1876_v26, %s2106_s28  ;;  %v57_v26 = vld [vmem:[%s3014_s0 + $0x63] sm:$0xff] }
  0x57   :  { %1887 = vrot.lane.b32.xlu2 %v1886_v31, %s2100_s21  ;;  %v2508_v31 = vld [vmem:[%s3014_s0 + $0x67] sm:$0xff] }
  0x58   :  { %v1961_v34 = vpack.i.bf16 %v2508_v31, %v2394_v45 }
  0x5c   :  { %1897 = vrot.lane.b32.xlu1 %v1896_v38, %s2103_s15 }
  0x5d   :  { %1892 = vrot.lane.b32.xlu0 %v1891_v40, %s2100_s21  ;;  %v1971_v40 = vpack.i.bf16 %v58_v27, %v57_v26 }
  0x5f   :  { %1902 = vrot.lane.b32.xlu2 %v1901_v46, %s2103_s15 }
  0x61   :  { %v2414_v54 = vpop.permute.xlu2 %1747 }
  0x62   :  { %v1750_v60 = vunpack.i.h.bf16 %v2414_v54  ;;  %v1749_v61 = vunpack.i.l.bf16 %v2414_v54  ;;  %v2539_v54 = vld [vmem:[%s3014_s0 + $0x6f] sm:$0xff] }
  0x64   :  { %1912 = vrot.lane.b32.xlu1 %v1911_v49, %s2099_s20 }
  0x65   :  { %1907 = vrot.lane.b32.xlu0 %v1906_v50, %s2099_s20 }
  0x67   :  { %1917 = vrot.lane.b32.xlu2 %v1916_v59, %s2102_s12 }
  0x69   :  { %v2453_v4 = vpop.permute.xlu2 %1752 }
  0x6c   :  { %1927 = vrot.lane.b32.xlu1 %v1926_v63, %s2101_s7  ;;  %v1755_v63 = vunpack.i.h.bf16 %v2453_v4 }
  0x6d   :  { %1922 = vrot.lane.b32.xlu0 %v1921_v0, %s2102_s12  ;;  %v1754_v0 = vunpack.i.l.bf16 %v2453_v4 }
  0x6f   :  { %1932 = vrot.lane.b32.xlu2 %v1931_v7, %s2101_s7  ;;  %v44_v7 = vld [vmem:[%s3014_s0 + $0x72] sm:$0xff] }
  0x71   :  { %v2478_v18 = vpop.permute.xlu2 %1767 }
  0x72   :  { %v1770_v30 = vunpack.i.h.bf16 %v2478_v18 }
  0x74   :  { %1942 = vrot.lane.b32.xlu1 %v1941_v14, %s2104_s22 }
  0x75   :  { %1937 = vrot.lane.b32.xlu0 %v1936_v15, %s2104_s22 }
  0x76   :  { %v1738_v20 = vpop.permute.xlu1 %1737 }
  0x77   :  { %v1728_v23 = vpop.permute.xlu0 %1727  ;;  %1947 = vrot.lane.b32.xlu2 %v1946_v19, %s2106_s28  ;;  %v1740_v47 = vunpack.i.h.bf16 %v1738_v20  ;;  %v1739_v48 = vunpack.i.l.bf16 %v1738_v20  ;;  %v59_v19 = vld [vmem:[%s3014_s0 + $0x73] sm:$0xff]  ;;  %v1976_v20 = vpack.i.bf16 %v2539_v54, %v2508_v31  ;;  %v1769_v31 = vunpack.i.l.bf16 %v2478_v18 }
  0x78   :  { %v1730_v32 = vunpack.i.h.bf16 %v1728_v23  ;;  %v1729_v33 = vunpack.i.l.bf16 %v1728_v23 }
  0x79   :  { %v2496_v28 = vpop.permute.xlu2 %1782 }
  0x7a   :  { %v589_v45 = vsel %vm588_vm1, %v15_v35, %v1729_v33  ;;  %v590_v49 = vsel %vm588_vm1, %v2152_v8, %v1730_v32  ;;  %v2571_v32 = vld [vmem:[%s3014_s0 + $0x69] sm:$0xff]  ;;  %v2576_v33 = vld [vmem:[%s3014_s0 + $0x71] sm:$0xff] }
  0x7b   :  { %v1986_v18 = vpack.i.bf16 %v2576_v33, %v2571_v32 }
  0x7c   :  { %1957 = vrot.lane.b32.xlu1 %v1956_v24, %s2105_s27 }
  0x7d   :  { %1952 = vrot.lane.b32.xlu0 %v1951_v25, %s2106_s28 }
  0x7e   :  { %v1743_v38 = vpop.permute.xlu1 %1742 }
  0x7f   :  { %v1733_v39 = vpop.permute.xlu0 %1732  ;;  %v1745_v42 = vunpack.i.h.bf16 %v1743_v38  ;;  %v1744_v43 = vunpack.i.l.bf16 %v1743_v38  ;;  %1962 = vrot.lane.b32.xlu2 %v1961_v34, %s2105_s27  ;;  %v1981_v34 = vpack.i.bf16 %v88_v22, %v87_v21 }
  0x80   :  { %v1735_v44 = vunpack.i.h.bf16 %v1733_v39  ;;  %v1734_v46 = vunpack.i.l.bf16 %v1733_v39 }
  0x81   :  { %v2524_v59 = vpop.permute.xlu2 %1797 }
  0x82   :  { %v605_v50 = vsel %vm604_vm2, %v589_v45, %v1734_v46  ;;  %v606_v51 = vsel %vm604_vm2, %v590_v49, %v1735_v44 }
  0x83   :  { %v621_v52 = vsel %vm620_vm3, %v605_v50, %v1739_v48  ;;  %v622_v53 = vsel %vm620_vm3, %v606_v51, %v1740_v47  ;;  %v103_v50 = vld [vmem:[%s3014_s0 + $0x6d] sm:$0xff]  ;;  %v104_v51 = vld [vmem:[%s3014_s0 + $0x75] sm:$0xff] }
  0x84   :  { %v637_v62 = vsel %vm636_vm4, %v621_v52, %v1744_v43  ;;  %v638_v8 = vsel %vm636_vm4, %v622_v53, %v1745_v42  ;;  %1972 = vrot.lane.b32.xlu1 %v1971_v40, %s2103_s15  ;;  %v591_v42 = vsel %vm588_vm1, %v2163_v11, %v1769_v31  ;;  %v74_v43 = vld [vmem:[%s3014_s0 + $0x77] sm:$0xff]  ;;  %v1785_v11 = vunpack.i.h.bf16 %v2496_v28 }
  0x85   :  { %1967 = vrot.lane.b32.xlu0 %v1966_v41, %s2100_s21  ;;  %v653_v1 = vsel %vm652_vm5, %v637_v62, %v1749_v61  ;;  %v654_v5 = vsel %vm652_vm5, %v638_v8, %v1750_v60  ;;  %v592_v41 = vsel %vm588_vm1, %v2221_v36, %v1770_v30  ;;  %v1784_v36 = vunpack.i.l.bf16 %v2496_v28  ;;  %v89_v52 = vld [vmem:[%s3014_s0 + $0x78] sm:$0xff] }
  0x86   :  { %v1763_v6 = vpop.permute.xlu1 %1762  ;;  %v669_v16 = vsel %vm668_vm6, %v653_v1, %v1754_v0  ;;  %v670_v17 = vsel %vm668_vm6, %v654_v5, %v1755_v63  ;;  %v90_v8 = vld [vmem:[%s3014_s0 + $0x79] sm:$0xff]  ;;  %v1991_v63 = vpack.i.bf16 %v104_v51, %v103_v50 }
  0x87   :  { %v1765_v9 = vunpack.i.h.bf16 %v1763_v6  ;;  %v1764_v10 = vunpack.i.l.bf16 %v1763_v6  ;;  %v1758_v4 = vpop.permute.xlu0 %1757  ;;  %165 = vrot.lane.b32.xlu2 %v44_v7, %s2100_s21  ;;  %v118_v7 = vld [vmem:[%s3014_s0 + $0x6e] sm:$0xff] }
  0x88   :  { %v1760_v14 = vunpack.i.h.bf16 %v1758_v4  ;;  %v1759_v15 = vunpack.i.l.bf16 %v1758_v4 }
  0x89   :  { %v2562_v27 = vpop.permute.xlu2 %1812 }
  0x8a   :  { %v685_v23 = vsel %vm684_vm7, %v669_v16, %v1759_v15  ;;  %v686_v24 = vsel %vm684_vm7, %v670_v17, %v1760_v14  ;;  %v1800_v15 = vunpack.i.h.bf16 %v2524_v59  ;;  %v1799_v16 = vunpack.i.l.bf16 %v2524_v59  ;;  %v105_v59 = vld [vmem:[%s3014_s0 + $0x7d] sm:$0xff] }
  0x8b   :  { %v701_v25 = vsel %vm700_vm8, %v685_v23, %v1764_v10  ;;  %v702_v26 = vsel %vm700_vm8, %v686_v24, %v1765_v9  ;;  %v119_v9 = vld [vmem:[%s3014_s0 + $0x76] sm:$0xff]  ;;  %v2001_v23 = vpack.i.bf16 %v74_v43, %v2539_v54 }
  0x8c   :  { %225 = vrot.lane.b32.xlu1 %v59_v19, %s2103_s15  ;;  %v716_v29 = vpack.c.bf16 %v702_v26, %v701_v25  ;;  %v1996_v17 = vpack.i.bf16 %v119_v9, %v118_v7  ;;  %s2108_s15 = smov 96  }
  0x8d   :  { %1977 = vrot.lane.b32.xlu0 %v1976_v20, %s2099_s20 }
  0x8e   :  { %1561 = vmatmul.msk.bf16.vlgmr.msra.gmra.mxu0 %vm762_vm9, %v716_v29  ;;  %v1778_v35 = vpop.permute.xlu1 %1777 }
  0x8f   :  { %v1773_v38 = vpop.permute.xlu0 %1772  ;;  %1982 = vrot.lane.b32.xlu2 %v1981_v34, %s2102_s12  ;;  %v1780_v44 = vunpack.i.h.bf16 %v1778_v35  ;;  %v1779_v46 = vunpack.i.l.bf16 %v1778_v35 }
  0x90   :  { %v1775_v39 = vunpack.i.h.bf16 %v1773_v38  ;;  %v1774_v40 = vunpack.i.l.bf16 %v1773_v38 }
  0x91   :  { %v2589_v47 = vpop.permute.xlu2 %1827 }
  0x92   :  { %v607_v48 = vsel %vm604_vm2, %v591_v42, %v1774_v40  ;;  %v608_v45 = vsel %vm604_vm2, %v592_v41, %v1775_v39  ;;  %v1815_v39 = vunpack.i.h.bf16 %v2562_v27  ;;  %v1814_v40 = vunpack.i.l.bf16 %v2562_v27  ;;  %v120_v41 = vld [vmem:[%s3014_s0 + $0x7e] sm:$0xff] }
  0x93   :  { %v623_v53 = vsel %vm620_vm3, %v607_v48, %v1779_v46  ;;  %v624_v60 = vsel %vm620_vm3, %v608_v45, %v1780_v44  ;;  %v1830_v51 = vunpack.i.h.bf16 %v2589_v47 }
  0x94   :  { %1987 = vrot.lane.b32.xlu1 %v1986_v18, %s2101_s7  ;;  %v639_v0 = vsel %vm636_vm4, %v623_v53, %v1784_v36  ;;  %v640_v1 = vsel %vm636_vm4, %v624_v60, %v1785_v11 }
  0x95   :  { %285 = vrot.lane.b32.xlu0 %v74_v43, %s2099_s20 }
  0x96   :  { %v1793_v49 = vpop.permute.xlu1 %1792 }
  0x97   :  { %v1788_v61 = vpop.permute.xlu0 %1787  ;;  %345 = vrot.lane.b32.xlu2 %v89_v52, %s2102_s12  ;;  %v1795_v5 = vunpack.i.h.bf16 %v1793_v49  ;;  %v1794_v6 = vunpack.i.l.bf16 %v1793_v49  ;;  %v121_v49 = vld [vmem:[%s3014_s0 + $0x7f] sm:$0xff]  ;;  %v1829_v52 = vunpack.i.l.bf16 %v2589_v47 }
  0x98   :  { %v1790_v62 = vunpack.i.h.bf16 %v1788_v61  ;;  %v1789_v28 = vunpack.i.l.bf16 %v1788_v61 }
  0x99   :  { %v2622_v14 = vpop.permute.xlu2 %1842 }
  0x9a   :  { %v655_v10 = vsel %vm652_vm5, %v639_v0, %v1789_v28  ;;  %v656_v4 = vsel %vm652_vm5, %v640_v1, %v1790_v62  ;;  %v1845_v1 = vunpack.i.h.bf16 %v2622_v14 }
  0x9b   :  { %v671_v19 = vsel %vm668_vm6, %v655_v10, %v1794_v6  ;;  %v672_v20 = vsel %vm668_vm6, %v656_v4, %v1795_v5  ;;  %v1844_v5 = vunpack.i.l.bf16 %v2622_v14 }
  0x9c   :  { %405 = vrot.lane.b32.xlu1 %v90_v8, %s2101_s7  ;;  %v687_v26 = vsel %vm684_vm7, %v671_v19, %v1799_v16  ;;  %v688_v29 = vsel %vm684_vm7, %v672_v20, %v1800_v15 }
  0x9d   :  { %1992 = vrot.lane.b32.xlu0 %v1991_v63, %s2104_s22 }
  0x9e   :  { %v1808_v21 = vpop.permute.xlu1 %1807 }
  0x9f   :  { %v1803_v22 = vpop.permute.xlu0 %1802  ;;  %1997 = vrot.lane.b32.xlu2 %v1996_v17, %s2106_s28  ;;  %v1810_v34 = vunpack.i.h.bf16 %v1808_v21  ;;  %v1809_v35 = vunpack.i.l.bf16 %v1808_v21 }
  0xa0   :  { %v1805_v24 = vunpack.i.h.bf16 %v1803_v22  ;;  %v1804_v25 = vunpack.i.l.bf16 %v1803_v22 }
  0xa1   :  { %v2639_v54 = vpop.permute.xlu2 %1857  ;;  %v593_v42 = vsel %vm588_vm1, %v2226_v37, %v1809_v35  ;;  %v594_v43 = vsel %vm588_vm1, %v2270_v56, %v1810_v34 }
  0xa2   :  { %v703_v30 = vsel %vm700_vm8, %v687_v26, %v1804_v25  ;;  %v704_v31 = vsel %vm700_vm8, %v688_v29, %v1805_v24  ;;  %v610_v45 = vsel %vm604_vm2, %v594_v43, %v1815_v39  ;;  %v609_v27 = vsel %vm604_vm2, %v593_v42, %v1814_v40 }
  0xa3   :  { %v717_v38 = vpack.c.bf16 %v704_v31, %v703_v30  ;;  %v1860_v29 = vunpack.i.h.bf16 %v2639_v54 }
  0xa4   :  { %2002 = vrot.lane.b32.xlu1 %v2001_v23, %s2105_s27 }
  0xa5   :  { %465 = vrot.lane.b32.xlu0 %v105_v59, %s2104_s22  ;;  %1562 = vmatmul.msk.bf16.gmra.mxu0 %vm762_vm9, %v717_v38  ;;  %v1859_v59 = vunpack.i.l.bf16 %v2639_v54 }
  0xa6   :  { %v1823_v18 = vpop.permute.xlu1 %1822 }
  0xa7   :  { %v1818_v44 = vpop.permute.xlu0 %1817  ;;  %525 = vrot.lane.b32.xlu2 %v120_v41, %s2106_s28  ;;  %v1825_v11 = vunpack.i.h.bf16 %v1823_v18  ;;  %v1824_v36 = vunpack.i.l.bf16 %v1823_v18 }
  0xa8   :  { %v1820_v46 = vunpack.i.h.bf16 %v1818_v44  ;;  %v1819_v48 = vunpack.i.l.bf16 %v1818_v44 }
  0xa9   :  { %v1873_v56 = vpop.permute.xlu2 %1872 }
  0xaa   :  { %v625_v37 = vsel %vm620_vm3, %v609_v27, %v1819_v48  ;;  %v626_v50 = vsel %vm620_vm3, %v610_v45, %v1820_v46  ;;  %v1875_v43 = vunpack.i.h.bf16 %v1873_v56  ;;  %v1874_v44 = vunpack.i.l.bf16 %v1873_v56 }
  0xab   :  { %v641_v53 = vsel %vm636_vm4, %v625_v37, %v1824_v36  ;;  %v642_v60 = vsel %vm636_vm4, %v626_v50, %v1825_v11 }
  0xac   :  { %v657_v6 = vsel %vm652_vm5, %v641_v53, %v1829_v52  ;;  %v658_v47 = vsel %vm652_vm5, %v642_v60, %v1830_v51 }
  0xad   :  { %571 = vrot.lane.b32.xlu0 %v121_v49, %s2105_s27 }
  0xae   :  { %v1838_v61 = vpop.permute.xlu1 %1837 }
  0xaf   :  { %v1840_v62 = vunpack.i.h.bf16 %v1838_v61  ;;  %v1839_v28 = vunpack.i.l.bf16 %v1838_v61  ;;  %v1833_v8 = vpop.permute.xlu0 %1832 }
  0xb0   :  { %v1835_v63 = vunpack.i.h.bf16 %v1833_v8  ;;  %v1834_v0 = vunpack.i.l.bf16 %v1833_v8 }
  0xb1   :  { %v1888_v20 = vpop.permute.xlu2 %1887 }
  0xb2   :  { %v673_v7 = vsel %vm668_vm6, %v657_v6, %v1834_v0  ;;  %v674_v9 = vsel %vm668_vm6, %v658_v47, %v1835_v63  ;;  %v1890_v47 = vunpack.i.h.bf16 %v1888_v20 }
  0xb3   :  { %v689_v10 = vsel %vm684_vm7, %v673_v7, %v1839_v28  ;;  %v690_v4 = vsel %vm684_vm7, %v674_v9, %v1840_v62  ;;  %v1889_v7 = vunpack.i.l.bf16 %v1888_v20 }
  0xb4   :  { %v705_v15 = vsel %vm700_vm8, %v689_v10, %v1844_v5  ;;  %v706_v16 = vsel %vm700_vm8, %v690_v4, %v1845_v1 }
  0xb5   :  { %v718_v17 = vpack.c.bf16 %v706_v16, %v705_v15 }
  0xb6   :  { %v1853_v19 = vpop.permute.xlu1 %1852 }
  0xb7   :  { %v1848_v14 = vpop.permute.xlu0 %1847  ;;  %1563 = vmatmul.msk.bf16.gmra.mxu0 %vm762_vm9, %v718_v17  ;;  %v1855_v23 = vunpack.i.h.bf16 %v1853_v19  ;;  %v1854_v24 = vunpack.i.l.bf16 %v1853_v19  ;;  %v598_v17 = vsel %vm588_vm1, %v2421_v55, %v1890_v47  ;;  %v597_v19 = vsel %vm588_vm1, %v2325_v13, %v1889_v7 }
  0xb8   :  { %v1850_v21 = vunpack.i.h.bf16 %v1848_v14  ;;  %v1849_v22 = vunpack.i.l.bf16 %v1848_v14 }
  0xb9   :  { %v2685_v40 = vpop.permute.xlu2 %1902 }
  0xba   :  { %v596_v25 = vsel %vm588_vm1, %v2320_v12, %v1850_v21  ;;  %v595_v26 = vsel %vm588_vm1, %v2275_v57, %v1849_v22  ;;  %v1905_v22 = vunpack.i.h.bf16 %v2685_v40 }
  0xbb   :  { %v611_v31 = vsel %vm604_vm2, %v595_v26, %v1854_v24  ;;  %v612_v34 = vsel %vm604_vm2, %v596_v25, %v1855_v23  ;;  %v1904_v23 = vunpack.i.l.bf16 %v2685_v40 }
  0xbc   :  { %v628_v18 = vsel %vm620_vm3, %v612_v34, %v1860_v29  ;;  %v627_v12 = vsel %vm620_vm3, %v611_v31, %v1859_v59 }
  0xbe   :  { %v1868_v30 = vpop.permute.xlu1 %1867 }
  0xbf   :  { %v1863_v35 = vpop.permute.xlu0 %1862  ;;  %v1870_v41 = vunpack.i.h.bf16 %v1868_v30  ;;  %v1869_v57 = vunpack.i.l.bf16 %v1868_v30 }
  0xc0   :  { %v1865_v38 = vunpack.i.h.bf16 %v1863_v35  ;;  %v1864_v39 = vunpack.i.l.bf16 %v1863_v35 }
  0xc1   :  { %v1918_v60 = vpop.permute.xlu2 %1917 }
  0xc2   :  { %v643_v42 = vsel %vm636_vm4, %v627_v12, %v1864_v39  ;;  %v644_v54 = vsel %vm636_vm4, %v628_v18, %v1865_v38  ;;  %v1920_v24 = vunpack.i.h.bf16 %v1918_v60  ;;  %v1919_v25 = vunpack.i.l.bf16 %v1918_v60 }
  0xc3   :  { %v659_v46 = vsel %vm652_vm5, %v643_v42, %v1869_v57  ;;  %v660_v48 = vsel %vm652_vm5, %v644_v54, %v1870_v41 }
  0xc4   :  { %v675_v50 = vsel %vm668_vm6, %v659_v46, %v1874_v44  ;;  %v676_v51 = vsel %vm668_vm6, %v660_v48, %v1875_v43 }
  0xc6   :  { %v1883_v45 = vpop.permute.xlu1 %1882 }
  0xc7   :  { %v1885_v27 = vunpack.i.h.bf16 %v1883_v45  ;;  %v1884_v11 = vunpack.i.l.bf16 %v1883_v45  ;;  %v1878_v36 = vpop.permute.xlu0 %1877 }
  0xc8   :  { %v1880_v49 = vunpack.i.h.bf16 %v1878_v36  ;;  %v1879_v37 = vunpack.i.l.bf16 %v1878_v36 }
  0xc9   :  { %v1933_v63 = vpop.permute.xlu2 %1932 }
  0xca   :  { %v691_v52 = vsel %vm684_vm7, %v675_v50, %v1879_v37  ;;  %v692_v53 = vsel %vm684_vm7, %v676_v51, %v1880_v49  ;;  %v1935_v41 = vunpack.i.h.bf16 %v1933_v63  ;;  %v1934_v57 = vunpack.i.l.bf16 %v1933_v63 }
  0xcb   :  { %v707_v56 = vsel %vm700_vm8, %v691_v52, %v1884_v11  ;;  %v708_v61 = vsel %vm700_vm8, %v692_v53, %v1885_v27 }
  0xcc   :  { %v719_v62 = vpack.c.bf16 %v708_v61, %v707_v56 }
  0xce   :  { %1564 = vmatmul.msk.bf16.gmra.mxu0 %vm762_vm9, %v719_v62  ;;  %v1898_v28 = vpop.permute.xlu1 %1897 }
  0xcf   :  { %v1893_v8 = vpop.permute.xlu0 %1892  ;;  %v1900_v10 = vunpack.i.h.bf16 %v1898_v28  ;;  %v1899_v4 = vunpack.i.l.bf16 %v1898_v28 }
  0xd0   :  { %v1895_v15 = vunpack.i.h.bf16 %v1893_v8  ;;  %v1894_v16 = vunpack.i.l.bf16 %v1893_v8 }
  0xd1   :  { %v1948_v6 = vpop.permute.xlu2 %1947  ;;  %v613_v20 = vsel %vm604_vm2, %v597_v19, %v1899_v4  ;;  %v614_v26 = vsel %vm604_vm2, %v598_v17, %v1900_v10 }
  0xd2   :  { %v600_v29 = vsel %vm588_vm1, %v2446_v2, %v1895_v15  ;;  %v599_v55 = vsel %vm588_vm1, %v2426_v58, %v1894_v16  ;;  %v1950_v43 = vunpack.i.h.bf16 %v1948_v6  ;;  %v1949_v44 = vunpack.i.l.bf16 %v1948_v6 }
  0xd3   :  { %v616_v54 = vsel %vm604_vm2, %v600_v29, %v1905_v22  ;;  %v615_v58 = vsel %vm604_vm2, %v599_v55, %v1904_v23 }
  0xd6   :  { %v1913_v0 = vpop.permute.xlu1 %1912 }
  0xd7   :  { %v1908_v1 = vpop.permute.xlu0 %1907  ;;  %v1915_v13 = vunpack.i.h.bf16 %v1913_v0  ;;  %v1914_v30 = vunpack.i.l.bf16 %v1913_v0 }
  0xd8   :  { %v1910_v14 = vunpack.i.h.bf16 %v1908_v1  ;;  %v1909_v21 = vunpack.i.l.bf16 %v1908_v1 }
  0xd9   :  { %v1963_v12 = vpop.permute.xlu2 %1962  ;;  %v631_v46 = vsel %vm620_vm3, %v615_v58, %v1914_v30  ;;  %v632_v48 = vsel %vm620_vm3, %v616_v54, %v1915_v13 }
  0xda   :  { %v629_v31 = vsel %vm620_vm3, %v613_v20, %v1909_v21  ;;  %v630_v34 = vsel %vm620_vm3, %v614_v26, %v1910_v14  ;;  %v1965_v56 = vunpack.i.h.bf16 %v1963_v12  ;;  %v1964_v61 = vunpack.i.l.bf16 %v1963_v12 }
  0xdb   :  { %v645_v45 = vsel %vm636_vm4, %v629_v31, %v1919_v25  ;;  %v646_v27 = vsel %vm636_vm4, %v630_v34, %v1920_v24  ;;  %v2743_v31 = vld [vmem:[%s3016_s2] ss:$0 sm:$0xff] }
  0xde   :  { %v1928_v5 = vpop.permute.xlu1 %1927 }
  0xdf   :  { %v1923_v9 = vpop.permute.xlu0 %1922  ;;  %v1930_v38 = vunpack.i.h.bf16 %v1928_v5  ;;  %v1929_v39 = vunpack.i.l.bf16 %v1928_v5 }
  0xe0   :  { %v1925_v40 = vunpack.i.h.bf16 %v1923_v9  ;;  %v1924_v18 = vunpack.i.l.bf16 %v1923_v9 }
  0xe1   :  { %v661_v11 = vsel %vm652_vm5, %v645_v45, %v1929_v39  ;;  %v662_v36 = vsel %vm652_vm5, %v646_v27, %v1930_v38  ;;  %v166_v19 = vpop.permute.xlu2 %165 }
  0xe2   :  { %v647_v49 = vsel %vm636_vm4, %v631_v46, %v1924_v18  ;;  %v648_v37 = vsel %vm636_vm4, %v632_v48, %v1925_v40 }
  0xe3   :  { %v663_v62 = vsel %vm652_vm5, %v647_v49, %v1934_v57  ;;  %v664_v28 = vsel %vm652_vm5, %v648_v37, %v1935_v41 }
  0xe6   :  { %v1943_v59 = vpop.permute.xlu1 %1942 }
  0xe7   :  { %v1938_v35 = vpop.permute.xlu0 %1937  ;;  %v1945_v50 = vunpack.i.h.bf16 %v1943_v59  ;;  %v1944_v51 = vunpack.i.l.bf16 %v1943_v59 }
  0xe8   :  { %v1940_v42 = vunpack.i.h.bf16 %v1938_v35  ;;  %v1939_v2 = vunpack.i.l.bf16 %v1938_v35 }
  0xe9   :  { %v679_v7 = vsel %vm668_vm6, %v663_v62, %v1944_v51  ;;  %v680_v9 = vsel %vm668_vm6, %v664_v28, %v1945_v50  ;;  %v1983_v25 = vpop.permute.xlu2 %1982 }
  0xea   :  { %v677_v52 = vsel %vm668_vm6, %v661_v11, %v1939_v2  ;;  %v678_v53 = vsel %vm668_vm6, %v662_v36, %v1940_v42  ;;  %v1985_v58 = vunpack.i.h.bf16 %v1983_v25  ;;  %v603_v36 = vsel %vm588_vm1, %v2576_v33, %v166_v19 }
  0xeb   :  { %v693_v1 = vsel %vm684_vm7, %v677_v52, %v1949_v44  ;;  %v694_v5 = vsel %vm684_vm7, %v678_v53, %v1950_v43  ;;  %v1984_v43 = vunpack.i.l.bf16 %v1983_v25 }
  0xee   :  { %v1958_v60 = vpop.permute.xlu1 %1957 }
  0xef   :  { %v1960_v8 = vunpack.i.h.bf16 %v1958_v60  ;;  %v1959_v63 = vunpack.i.l.bf16 %v1958_v60  ;;  %v1953_v0 = vpop.permute.xlu0 %1952 }
  0xf0   :  { %v1955_v6 = vunpack.i.h.bf16 %v1953_v0  ;;  %v1954_v47 = vunpack.i.l.bf16 %v1953_v0 }
  0xf1   :  { %v709_v10 = vsel %vm700_vm8, %v693_v1, %v1959_v63  ;;  %v710_v4 = vsel %vm700_vm8, %v694_v5, %v1960_v8  ;;  %v346_v55 = vpop.permute.xlu2 %345 }
  0xf2   :  { %v695_v15 = vsel %vm684_vm7, %v679_v7, %v1954_v47  ;;  %v696_v16 = vsel %vm684_vm7, %v680_v9, %v1955_v6  ;;  %v720_v17 = vpack.c.bf16 %v710_v4, %v709_v10 }
  0xf3   :  { %v711_v14 = vsel %vm700_vm8, %v695_v15, %v1964_v61  ;;  %v712_v21 = vsel %vm700_vm8, %v696_v16, %v1965_v56  ;;  %v2107_v61 = vmov 0.0  }
  0xf4   :  { %1565 = vmatmul.msk.bf16.gmra.mxu0 %vm762_vm9, %v720_v17  ;;  %v721_v22 = vpack.c.bf16 %v712_v21, %v711_v14  ;;  %870 = vst.msk [vmem:[#allocation3 + $0x8] sm:$0xff] %vm636_vm4, %v2107_v61 }
  0xf5   :  { %871 = vst.msk [vmem:[#allocation3 + $0x10] sm:$0xff] %vm636_vm4, %v2107_v61 }
  0xf6   :  { %1566 = vmatmul.msk.bf16.vlgmr.msra.gmra.mxu1 %vm762_vm9, %v721_v22  ;;  %v1973_v23 = vpop.permute.xlu1 %1972  ;;  %872 = vst.msk [vmem:[#allocation3 + $0x18] sm:$0xff] %vm636_vm4, %v2107_v61 }
  0xf7   :  { %v1968_v24 = vpop.permute.xlu0 %1967  ;;  %v1975_v34 = vunpack.i.h.bf16 %v1973_v23  ;;  %v1974_v35 = vunpack.i.l.bf16 %v1973_v23  ;;  %869 = vst.msk [vmem:[#allocation3] sm:$0xff] %vm636_vm4, %v2107_v61 }
  0xf8   :  { %v1970_v59 = vunpack.i.h.bf16 %v1968_v24  ;;  %v1969_v30 = vunpack.i.l.bf16 %v1968_v24  ;;  %873 = vst.msk [vmem:[#allocation3 + $0x20] sm:$0xff] %vm636_vm4, %v2107_v61 }
  0xf9   :  { %874 = vst.msk [vmem:[#allocation3 + $0x28] sm:$0xff] %vm636_vm4, %v2107_v61 }
  0xfa   :  { %v602_v38 = vsel %vm588_vm1, %v2571_v32, %v1970_v59  ;;  %v601_v40 = vsel %vm588_vm1, %v2451_v3, %v1969_v30  ;;  %v1998_v3 = vpop.permute.xlu2 %1997  ;;  %875 = vst.msk [vmem:[#allocation3 + $0x30] sm:$0xff] %vm636_vm4, %v2107_v61 }
  0xfb   :  { %v617_v2 = vsel %vm604_vm2, %v601_v40, %v1974_v35  ;;  %v618_v54 = vsel %vm604_vm2, %v602_v38, %v1975_v34  ;;  %v2000_v50 = vunpack.i.h.bf16 %v1998_v3  ;;  %v1999_v60 = vunpack.i.l.bf16 %v1998_v3  ;;  %876 = vst.msk [vmem:[#allocation3 + $0x38] sm:$0xff] %vm636_vm4, %v2107_v61 }
  0xfc   :  { %1414 = vst [vmem:[#allocation5] sm:$0xff] %v2107_v61 }
  0xfe   :  { %v226_v20 = vpop.permute.xlu1 %225 }
  0xff   :  { %v1978_v26 = vpop.permute.xlu0 %1977  ;;  %v619_v28 = vsel %vm604_vm2, %v603_v36, %v226_v20 }
 0x100   :  { %v1980_v18 = vunpack.i.h.bf16 %v1978_v26  ;;  %v1979_v12 = vunpack.i.l.bf16 %v1978_v26 }
 0x102   :  { %v633_v46 = vsel %vm620_vm3, %v617_v2, %v1979_v12  ;;  %v634_v32 = vsel %vm620_vm3, %v618_v54, %v1980_v18  ;;  %v526_v19 = vpop.permute.xlu2 %525 }
 0x103   :  { %v650_v49 = vsel %vm636_vm4, %v634_v32, %v1985_v58  ;;  %v649_v37 = vsel %vm636_vm4, %v633_v46, %v1984_v43  ;;  %v1697_v43 = vld [vmem:[%s3015_s1 + $0xb0] sm:$0xff] }
 0x104   :  { %1384 = vmatpush.bf16.msrb.mxu3 %v1697_v43 }
 0x106   :  { %v1988_v29 = vpop.permute.xlu1 %1987 }
 0x107   :  { %v286_v13 = vpop.permute.xlu0 %285  ;;  %v1990_v48 = vunpack.i.h.bf16 %v1988_v29  ;;  %v1989_v45 = vunpack.i.l.bf16 %v1988_v29 }
 0x108   :  { %v635_v0 = vsel %vm620_vm3, %v619_v28, %v286_v13 }
 0x109   :  { %v665_v52 = vsel %vm652_vm5, %v649_v37, %v1989_v45  ;;  %v666_v53 = vsel %vm652_vm5, %v650_v49, %v1990_v48  ;;  %v651_v4 = vsel %vm636_vm4, %v635_v0, %v346_v55 }
 0x10b   :  { %v800_v39 = vpop.f32.mrf.mxu0 }
 0x10c   :  { %v801_v41 = vadd.f32 %v2743_v31, %v800_v39 }
 0x10e   :  { %v839_v57 = vmax.f32 %v801_v41, 0.0  ;;  %v406_v42 = vpop.permute.xlu1 %405 }
 0x10f   :  { %v1993_v44 = vpop.permute.xlu0 %1992  ;;  %v667_v16 = vsel %vm652_vm5, %v651_v4, %v406_v42 }
 0x110   :  { %854 = vst.msk [vmem:[#allocation2] sm:$0xff] %vm636_vm4, %v839_v57  ;;  %v1995_v27 = vunpack.i.h.bf16 %v1993_v44  ;;  %v1994_v11 = vunpack.i.l.bf16 %v1993_v44  ;;  %v1696_v44 = vld [vmem:[%s3015_s1 + $0xa8] sm:$0xff] }
 0x111   :  { %1385 = vmatpush.bf16.msrb.mxu3 %v1696_v44 }
 0x112   :  { %v681_v62 = vsel %vm668_vm6, %v665_v52, %v1994_v11  ;;  %v682_v33 = vsel %vm668_vm6, %v666_v53, %v1995_v27 }
 0x113   :  { %v802_v51 = vpop.f32.mrf.mxu0  ;;  %v697_v47 = vsel %vm684_vm7, %v681_v62, %v1999_v60  ;;  %v698_v7 = vsel %vm684_vm7, %v682_v33, %v2000_v50  ;;  %v957_v62 = vld [vmem:[#allocation3 + $0x4] sm:$0xff] }
 0x114   :  { %v803_v56 = vadd.f32 %v2743_v31, %v802_v51 }
 0x116   :  { %v840_v8 = vmax.f32 %v803_v56, 0.0  ;;  %v2003_v63 = vpop.permute.xlu1 %2002 }
 0x117   :  { %v2005_v1 = vunpack.i.h.bf16 %v2003_v63  ;;  %v2004_v5 = vunpack.i.l.bf16 %v2003_v63  ;;  %v466_v6 = vpop.permute.xlu0 %465 }
 0x118   :  { %855 = vst.msk [vmem:[#allocation2 + $0x8] sm:$0xff] %vm636_vm4, %v840_v8  ;;  %v683_v17 = vsel %vm668_vm6, %v667_v16, %v466_v6 }
 0x119   :  { %v713_v9 = vsel %vm700_vm8, %v697_v47, %v2004_v5  ;;  %v714_v10 = vsel %vm700_vm8, %v698_v7, %v2005_v1  ;;  %v699_v14 = vsel %vm684_vm7, %v683_v17, %v526_v19 }
 0x11a   :  { %v722_v15 = vpack.c.bf16 %v714_v10, %v713_v9  ;;  %v963_v10 = vld [vmem:[#allocation3 + $0x5] sm:$0xff] }
 0x11c   :  { %1567 = vmatmul.msk.bf16.gmra.mxu1 %vm762_vm9, %v722_v15 }
 0x11f   :  { %v572_v21 = vpop.permute.xlu0 %571  ;;  %v877_v59 = vld [vmem:[#allocation2 + $0x7] sm:$0xf] }
 0x120   :  { %v715_v22 = vsel %vm700_vm8, %v699_v14, %v572_v21 }
 0x121   :  { %v723_v23 = vpack.c.bf16 %v715_v22, %v715_v22 }
 0x122   :  { %v805_v24 = vpop.f32.mrf.mxu0 }
 0x123   :  { %v806_v25 = vadd.f32 %v2743_v31, %v805_v24  ;;  %1568 = vmatmul.msk.bf16.vlgmr.msra.gmra.mxu3 %vm762_vm9, %v723_v23 }
 0x125   :  { %v841_v20 = vmax.f32 %v806_v25, 0.0 }
 0x127   :  { %856 = vst.msk [vmem:[#allocation2 + $0x10] sm:$0xff] %vm636_vm4, %v841_v20 }
 0x12a   :  { %v807_v26 = vpop.f32.mrf.mxu0 }
 0x12b   :  { %v808_v29 = vadd.f32 %v2743_v31, %v807_v26 }
 0x12d   :  { %v842_v55 = vmax.f32 %v808_v29, 0.0 }
 0x12e   :  { %v878_v13 = vld [vmem:[#allocation2 + $0xd] sm:$0xf]  ;;  %v888_v40 = vld [vmem:[#allocation2 + $0x13] sm:$0xf] }
 0x12f   :  { %v879_v30 = vmax.f32 %v877_v59, %v878_v13  ;;  %857 = vst.msk [vmem:[#allocation2 + $0x18] sm:$0xff] %vm636_vm4, %v842_v55 }
 0x131   :  { %v881_v34 = vrot.slane %v879_v30, 1 }
 0x133   :  { %v883_v35 = vmax.f32 %v879_v30, %v881_v34 }
 0x134   :  { %v810_v38 = vpop.f32.mrf.mxu0 }
 0x135   :  { %v811_v39 = vadd.f32 %v2743_v31, %v810_v38  ;;  %885 = vst.msk [vmem:[#allocation3 + $0xd] sm:$0x1] %vm884_vm10, %v883_v35 }
 0x136   :  { %v889_v18 = vld [vmem:[#allocation2 + $0x19] sm:$0xf]  ;;  %887 = vst.msk [vmem:[#allocation3 + $0xc] sm:$0x4] %vm886_vm11, %v883_v35 }
 0x137   :  { %v890_v12 = vmax.f32 %v888_v40, %v889_v18  ;;  %v843_v41 = vmax.f32 %v811_v39, 0.0 }
 0x139   :  { %v892_v57 = vrot.slane %v890_v12, 1  ;;  %858 = vst.msk [vmem:[#allocation2 + $0x20] sm:$0xff] %vm636_vm4, %v843_v41 }
 0x13b   :  { %v894_v42 = vmax.f32 %v890_v12, %v892_v57 }
 0x13c   :  { %v812_v2 = vpop.f32.mrf.mxu0 }
 0x13d   :  { %v813_v54 = vadd.f32 %v2743_v31, %v812_v2  ;;  %895 = vst.msk [vmem:[#allocation3 + $0x11] sm:$0x1] %vm884_vm10, %v894_v42  ;;  %v981_v52 = vld [vmem:[#allocation3 + $0x9] sm:$0xff] }
 0x13e   :  { %896 = vst.msk [vmem:[#allocation3 + $0x10] sm:$0x4] %vm886_vm11, %v894_v42  ;;  %v969_v4 = vld [vmem:[#allocation3 + $0x7] sm:$0xff]  ;;  %v2841_v42 = vld [vmem:[#allocation3 + $0x1b] sm:$0xff] }
 0x13f   :  { %v844_v58 = vmax.f32 %v813_v54, 0.0  ;;  %v966_v54 = vld [vmem:[#allocation3 + $0x1d] sm:$0xff] }
 0x140   :  { %v897_v46 = vld [vmem:[#allocation2 + $0x1f] sm:$0xf] }
 0x141   :  { %859 = vst.msk [vmem:[#allocation2 + $0x28] sm:$0xff] %vm636_vm4, %v844_v58  ;;  %v960_v58 = vld [vmem:[#allocation3 + $0x1c] sm:$0xff] }
 0x145   :  { %v958_v33 = vld [vmem:[#allocation3 + $0xc] sm:$0xff] }
 0x146   :  { %v2011_v28 = vpack.i.bf16 %v958_v33, %v957_v62  ;;  %v964_v8 = vld [vmem:[#allocation3 + $0xd] sm:$0xff] }
 0x147   :  { %v2812_v63 = vld [vmem:[#allocation3 + $0xb] sm:$0xff]  ;;  %v2021_v16 = vpack.i.bf16 %v964_v8, %v963_v10 }
 0x148   :  { %v898_v32 = vld [vmem:[#allocation2 + $0x25] sm:$0xf]  ;;  %v906_v37 = vld [vmem:[#allocation2 + $0x2b] sm:$0xf] }
 0x149   :  { %v899_v48 = vmax.f32 %v897_v46, %v898_v32  ;;  %v1692_v10 = vld [vmem:[%s3015_s1 + $0x88] sm:$0xff] }
 0x14b   :  { %v901_v45 = vrot.slane %v899_v48, 1  ;;  %v815_v3 = vpop.f32.mrf.mxu0 }
 0x14c   :  { %v816_v27 = vadd.f32 %v2743_v31, %v815_v3 }
 0x14d   :  { %v903_v11 = vmax.f32 %v899_v48, %v901_v45 }
 0x14e   :  { %v845_v36 = vmax.f32 %v816_v27, 0.0 }
 0x14f   :  { %904 = vst.msk [vmem:[#allocation3 + $0x15] sm:$0x1] %vm884_vm10, %v903_v11 }
 0x150   :  { %860 = vst.msk [vmem:[#allocation2 + $0x30] sm:$0xff] %vm636_vm4, %v845_v36 }
 0x151   :  { %905 = vst.msk [vmem:[#allocation3 + $0x14] sm:$0x4] %vm886_vm11, %v903_v11  ;;  %v1695_v11 = vld [vmem:[%s3015_s1 + $0xa0] sm:$0xff] }
 0x152   :  { %1354 = vmatpush.bf16.msra.mxu2 %v1695_v11 }
 0x153   :  { %v817_v49 = vpop.f32.mrf.mxu0 }
 0x157   :  { %v907_v50 = vld [vmem:[#allocation2 + $0x31] sm:$0xf] }
 0x158   :  { %v908_v51 = vmax.f32 %v906_v37, %v907_v50  ;;  %v982_v53 = vld [vmem:[#allocation3 + $0x11] sm:$0xff] }
 0x159   :  { %v2006_v60 = vpack.i.bf16 %v982_v53, %v981_v52  ;;  %v970_v9 = vld [vmem:[#allocation3 + $0xf] sm:$0xff] }
 0x15a   :  { %v910_v56 = vrot.slane %v908_v51, 1  ;;  %v2031_v15 = vpack.i.bf16 %v970_v9, %v969_v4 }
 0x15b   :  { %2007 = vrot.lane.b32.xlu1 %v2006_v60, %s2102_s12 }
 0x15c   :  { %v912_v61 = vmax.f32 %v908_v51, %v910_v56 }
 0x15e   :  { %913 = vst.msk [vmem:[#allocation3 + $0x19] sm:$0x1] %vm884_vm10, %v912_v61 }
 0x15f   :  { %914 = vst.msk [vmem:[#allocation3 + $0x18] sm:$0x4] %vm886_vm11, %v912_v61 }
 0x163   :  { %2012 = vrot.lane.b32.xlu1 %v2011_v28, %s2102_s12  ;;  %v1687_v28 = vld [vmem:[%s3015_s1 + $0x60] sm:$0xff] }
 0x164   :  { %1330 = vmatpush.bf16.msrb.mxu1 %v1687_v28 }
 0x166   :  { %v2814_v0 = vld [vmem:[#allocation3 + $0x15] sm:$0xff] }
 0x167   :  { %v2816_v1 = vld [vmem:[#allocation3 + $0x14] sm:$0xff]  ;;  %v1168_v6 = vpack.c.bf16 %v2814_v0, %v964_v8  ;;  %v2051_v52 = vpack.i.bf16 %v966_v54, %v2814_v0 }
 0x168   :  { %v2818_v5 = vld [vmem:[#allocation3 + $0x13] sm:$0xff]  ;;  %v2026_v47 = vpack.i.bf16 %v2816_v1, %v958_v33  ;;  %v2041_v37 = vpack.i.bf16 %v960_v58, %v2816_v1  ;;  %v1694_v33 = vld [vmem:[%s3015_s1 + $0x98] sm:$0xff] }
 0x169   :  { %v2016_v7 = vpack.i.bf16 %v2818_v5, %v2812_v63  ;;  %1641 = vmatmul.msk.bf16.vlgmr.msrb.gmra.mxu3 %vm636_vm4, %v1168_v6  ;;  %v983_v41 = vld [vmem:[#allocation3 + $0x19] sm:$0xff]  ;;  %1355 = vmatpush.bf16.msra.mxu2 %v1694_v33 }
 0x16a   :  { %2027 = vrot.lane.b32.xlu0 %v2026_v47, %s2108_s15  ;;  %v971_v50 = vld [vmem:[#allocation3 + $0x17] sm:$0xff] }
 0x16b   :  { %2017 = vrot.lane.b32.xlu2 %v2016_v7, %s2105_s27  ;;  %v1693_v6 = vld [vmem:[%s3015_s1 + $0x90] sm:$0xff] }
 0x16d   :  { %1356 = vmatpush.bf16.msra.mxu2 %v1693_v6 }
 0x171   :  { %v820_v17 = vpop.f32.mrf.mxu0  ;;  %1357 = vmatpush.bf16.msra.mxu2 %v1692_v10 }
 0x172   :  { %2032 = vrot.lane.b32.xlu0 %v2031_v15, %s2108_s15  ;;  %v821_v19 = vadd.f32 %v2743_v31, %v820_v17  ;;  %v1685_v15 = vld [vmem:[%s3015_s1 + $0x50] sm:$0xff] }
 0x173   :  { %2022 = vrot.lane.b32.xlu2 %v2021_v16, %s2105_s27  ;;  %v825_v14 = vpop.f32.mrf.mxu1  ;;  %v1691_v16 = vld [vmem:[%s3015_s1 + $0x80] sm:$0xff] }
 0x174   :  { %v847_v21 = vmax.f32 %v821_v19, 0.0  ;;  %v826_v22 = vadd.f32 %v2743_v31, %v825_v14 }
 0x175   :  { %1358 = vmatpush.bf16.msra.mxu2 %v1691_v16 }
 0x176   :  { %862 = vst.msk [vmem:[#allocation2 + $0x40] sm:$0xff] %vm636_vm4, %v847_v21  ;;  %v849_v23 = vmax.f32 %v826_v22, 0.0  ;;  %v1684_v22 = vld [vmem:[%s3015_s1 + $0x48] sm:$0xff] }
 0x178   :  { %864 = vst.msk [vmem:[#allocation2 + $0x50] sm:$0xff] %vm636_vm4, %v849_v23  ;;  %v1690_v23 = vld [vmem:[%s3015_s1 + $0x78] sm:$0xff] }
 0x179   :  { %v822_v24 = vpop.f32.mrf.mxu0  ;;  %1359 = vmatpush.bf16.msra.mxu2 %v1690_v23 }
 0x17a   :  { %v823_v25 = vadd.f32 %v2743_v31, %v822_v24 }
 0x17b   :  { %v827_v20 = vpop.f32.mrf.mxu1 }
 0x17c   :  { %v848_v26 = vmax.f32 %v823_v25, 0.0  ;;  %v828_v29 = vadd.f32 %v2743_v31, %v827_v20  ;;  %v1683_v25 = vld [vmem:[%s3015_s1 + $0x40] sm:$0xff]  ;;  %v1689_v20 = vld [vmem:[%s3015_s1 + $0x70] sm:$0xff] }
 0x17d   :  { %v915_v59 = vld [vmem:[#allocation2 + $0x43] sm:$0xf]  ;;  %1360 = vmatpush.bf16.msra.mxu2 %v1689_v20 }
 0x17e   :  { %863 = vst.msk [vmem:[#allocation2 + $0x48] sm:$0xff] %vm636_vm4, %v848_v26  ;;  %v850_v55 = vmax.f32 %v828_v29, 0.0  ;;  %v1682_v26 = vld [vmem:[%s3015_s1 + $0x38] sm:$0xff]  ;;  %v1688_v29 = vld [vmem:[%s3015_s1 + $0x68] sm:$0xff] }
 0x180   :  { %865 = vst.msk [vmem:[#allocation2 + $0x58] sm:$0xff] %vm636_vm4, %v850_v55  ;;  %v989_v55 = vld [vmem:[#allocation3 + $0x35] sm:$0xff] }
 0x181   :  { %1361 = vmatpush.bf16.msra.mxu2 %v1688_v29  ;;  %v977_v29 = vld [vmem:[#allocation3 + $0x18] sm:$0xff] }
 0x185   :  { %v916_v13 = vld [vmem:[#allocation2 + $0x49] sm:$0xf]  ;;  %v924_v30 = vld [vmem:[#allocation2 + $0x4f] sm:$0xf] }
 0x186   :  { %v917_v34 = vmax.f32 %v915_v59, %v916_v13  ;;  %v988_v59 = vld [vmem:[#allocation3 + $0x34] sm:$0xff] }
 0x187   :  { %v925_v35 = vld [vmem:[#allocation2 + $0x55] sm:$0xf]  ;;  %v933_v56 = vld [vmem:[#allocation2 + $0x5b] sm:$0xf] }
 0x188   :  { %v919_v38 = vrot.slane %v917_v34, 1  ;;  %v926_v39 = vmax.f32 %v924_v30, %v925_v35  ;;  %v987_v30 = vld [vmem:[#allocation3 + $0x33] sm:$0xff] }
 0x18a   :  { %v921_v40 = vmax.f32 %v917_v34, %v919_v38  ;;  %v928_v18 = vrot.slane %v926_v39, 1 }
 0x18c   :  { %922 = vst.msk [vmem:[#allocation3 + $0x25] sm:$0x1] %vm884_vm10, %v921_v40  ;;  %v930_v12 = vmax.f32 %v926_v39, %v928_v18 }
 0x18d   :  { %923 = vst.msk [vmem:[#allocation3 + $0x24] sm:$0x4] %vm886_vm11, %v921_v40 }
 0x18e   :  { %931 = vst.msk [vmem:[#allocation3 + $0x29] sm:$0x1] %vm884_vm10, %v930_v12 }
 0x18f   :  { %932 = vst.msk [vmem:[#allocation3 + $0x28] sm:$0x4] %vm886_vm11, %v930_v12 }
 0x194   :  { %v984_v57 = vld [vmem:[#allocation3 + $0x21] sm:$0xff] }
 0x195   :  { %v2036_v2 = vpack.i.bf16 %v984_v57, %v983_v41  ;;  %v972_v49 = vld [vmem:[#allocation3 + $0x1f] sm:$0xff] }
 0x196   :  { %v2843_v43 = vld [vmem:[#allocation3 + $0x25] sm:$0xff]  ;;  %v2066_v51 = vpack.i.bf16 %v972_v49, %v971_v50  ;;  %v1681_v41 = vld [vmem:[%s3015_s1 + $0x30] sm:$0xff]  ;;  %v976_v49 = vld [vmem:[#allocation3 + $0x10] sm:$0xff] }
 0x197   :  { %v2845_v44 = vld [vmem:[#allocation3 + $0x24] sm:$0xff]  ;;  %2037 = vrot.lane.b32.xlu1 %v2036_v2, %s2102_s12  ;;  %v1171_v32 = vpack.c.bf16 %v2843_v43, %v966_v54  ;;  %v1680_v2 = vld [vmem:[%s3015_s1 + $0x28] sm:$0xff] }
 0x198   :  { %v2847_v46 = vld [vmem:[#allocation3 + $0x23] sm:$0xff]  ;;  %v2061_v48 = vpack.i.bf16 %v2845_v44, %v960_v58 }
 0x199   :  { %v2046_v45 = vpack.i.bf16 %v2847_v46, %v2841_v42  ;;  %1642 = vmatmul.msk.bf16.gmra.mxu3 %vm636_vm4, %v1171_v32  ;;  %v830_v3 = vpop.f32.mrf.mxu1 }
 0x19a   :  { %2062 = vrot.lane.b32.xlu0 %v2061_v48, %s2108_s15  ;;  %v831_v27 = vadd.f32 %v2743_v31, %v830_v3 }
 0x19b   :  { %2047 = vrot.lane.b32.xlu2 %v2046_v45, %s2105_s27 }
 0x19c   :  { %v851_v36 = vmax.f32 %v831_v27, 0.0 }
 0x19e   :  { %866 = vst.msk [vmem:[#allocation2 + $0x60] sm:$0xff] %vm636_vm4, %v851_v36 }
 0x19f   :  { %2042 = vrot.lane.b32.xlu1 %v2041_v37, %s2102_s12  ;;  %v975_v37 = vld [vmem:[#allocation3 + $0x8] sm:$0xff] }
 0x1a1   :  { %v832_v53 = vpop.f32.mrf.mxu1 }
 0x1a2   :  { %2067 = vrot.lane.b32.xlu0 %v2066_v51, %s2108_s15  ;;  %v833_v60 = vadd.f32 %v2743_v31, %v832_v53 }
 0x1a3   :  { %2052 = vrot.lane.b32.xlu2 %v2051_v52, %s2105_s27 }
 0x1a4   :  { %v852_v61 = vmax.f32 %v833_v60, 0.0 }
 0x1a5   :  { %v934_v62 = vld [vmem:[#allocation2 + $0x61] sm:$0xf] }
 0x1a6   :  { %v935_v8 = vmax.f32 %v933_v56, %v934_v62  ;;  %867 = vst.msk [vmem:[#allocation2 + $0x68] sm:$0xff] %vm636_vm4, %v852_v61  ;;  %v835_v0 = vpop.f32.mrf.mxu3 }
 0x1a7   :  { %v836_v1 = vadd.f32 %v2743_v31, %v835_v0  ;;  %v1686_v31 = vld [vmem:[%s3015_s1 + $0x58] sm:$0xff] }
 0x1a8   :  { %v937_v47 = vrot.slane %v935_v8, 1  ;;  %1331 = vmatpush.bf16.msrb.mxu1 %v1686_v31 }
 0x1a9   :  { %v853_v7 = vmax.f32 %v836_v1, 0.0  ;;  %v951_v1 = vld [vmem:[#allocation3 + $0x3] sm:$0xff] }
 0x1aa   :  { %v939_v9 = vmax.f32 %v935_v8, %v937_v47 }
 0x1ab   :  { %868 = vst.msk [vmem:[#allocation2 + $0x70] sm:$0xff] %vm636_vm4, %v853_v7 }
 0x1ac   :  { %940 = vst.msk [vmem:[#allocation3 + $0x2d] sm:$0x1] %vm884_vm10, %v939_v9  ;;  %1332 = vmatpush.bf16.msrb.mxu1 %v1685_v15 }
 0x1ad   :  { %941 = vst.msk [vmem:[#allocation3 + $0x2c] sm:$0x4] %vm886_vm11, %v939_v9  ;;  %v942_v17 = vld [vmem:[#allocation2 + $0x67] sm:$0xf] }
 0x1ae   :  { %v837_v4 = vpop.f32.mrf.mxu3 }
 0x1b0   :  { %1333 = vmatpush.bf16.msrb.mxu1 %v1684_v22 }
 0x1b2   :  { %v943_v19 = vld [vmem:[#allocation2 + $0x6d] sm:$0xf] }
 0x1b3   :  { %v944_v14 = vmax.f32 %v942_v17, %v943_v19 }
 0x1b4   :  { %1334 = vmatpush.bf16.msrb.mxu1 %v1683_v25  ;;  %v985_v13 = vld [vmem:[#allocation3 + $0x29] sm:$0xff] }
 0x1b5   :  { %v946_v21 = vrot.slane %v944_v14, 1  ;;  %v973_v58 = vld [vmem:[#allocation3 + $0x27] sm:$0xff] }
 0x1b7   :  { %v948_v24 = vmax.f32 %v944_v14, %v946_v21 }
 0x1b8   :  { %1335 = vmatpush.bf16.msrb.mxu1 %v1682_v26 }
 0x1b9   :  { %949 = vst.msk [vmem:[#allocation3 + $0x31] sm:$0x1] %vm884_vm10, %v948_v24 }
 0x1ba   :  { %950 = vst.msk [vmem:[#allocation3 + $0x30] sm:$0x4] %vm886_vm11, %v948_v24 }
 0x1bc   :  { %1336 = vmatpush.bf16.msrb.mxu1 %v1681_v41 }
 0x1c0   :  { %1337 = vmatpush.bf16.msrb.mxu1 %v1680_v2 }
 0x1c1   :  { %v968_v34 = vld [vmem:[#allocation3 + $0x2d] sm:$0xff] }
 0x1c2   :  { %v962_v35 = vld [vmem:[#allocation3 + $0x2c] sm:$0xff]  ;;  %v1174_v39 = vpack.c.bf16 %v989_v55, %v968_v34  ;;  %v2086_v45 = vpack.i.bf16 %v968_v34, %v2843_v43  ;;  %v978_v55 = vld [vmem:[#allocation3 + $0x20] sm:$0xff] }
 0x1c3   :  { %v986_v38 = vld [vmem:[#allocation3 + $0x31] sm:$0xff]  ;;  %v2071_v40 = vpack.i.bf16 %v988_v59, %v962_v35  ;;  %v2081_v48 = vpack.i.bf16 %v962_v35, %v2845_v44 }
 0x1c4   :  { %v2076_v18 = vpack.i.bf16 %v986_v38, %v985_v13  ;;  %v2914_v12 = vld [vmem:[#allocation3 + $0x2b] sm:$0xff]  ;;  %1643 = vmatmul.msk.bf16.gmra.mxu3 %vm636_vm4, %v1174_v39 }
 0x1c5   :  { %v2056_v57 = vpack.i.bf16 %v987_v30, %v2914_v12  ;;  %2072 = vrot.lane.b32.xlu0 %v2071_v40, %s2108_s15  ;;  %v974_v54 = vld [vmem:[#allocation3 + $0x2f] sm:$0xff]  ;;  %v2018_v27 = vpop.permute.xlu2 %2017 }
 0x1c6   :  { %2077 = vrot.lane.b32.xlu1 %v2076_v18, %s2102_s12  ;;  %v2091_v32 = vpack.i.bf16 %v974_v54, %v973_v58  ;;  %v2020_v52 = vunpack.i.h.bf16 %v2018_v27  ;;  %v2019_v44 = vunpack.i.l.bf16 %v2018_v27 }
 0x1c7   :  { %2057 = vrot.lane.b32.xlu2 %v2056_v57, %s2105_s27 }
 0x1cd   :  { %2092 = vrot.lane.b32.xlu0 %v2091_v32, %s2108_s15  ;;  %v2008_v3 = vpop.permute.xlu1 %2007  ;;  %v2023_v47 = vpop.permute.xlu2 %2022 }
 0x1ce   :  { %2082 = vrot.lane.b32.xlu1 %v2081_v48, %s2102_s12  ;;  %v2010_v11 = vunpack.i.h.bf16 %v2008_v3  ;;  %v2009_v36 = vunpack.i.l.bf16 %v2008_v3  ;;  %v2025_v31 = vunpack.i.h.bf16 %v2023_v47  ;;  %v2024_v10 = vunpack.i.l.bf16 %v2023_v47 }
 0x1cf   :  { %2087 = vrot.lane.b32.xlu2 %v2086_v45, %s2105_s27 }
 0x1d0   :  { %v1149_v50 = vsel %vm636_vm4, %v976_v49, %v2010_v11  ;;  %v1148_v51 = vsel %vm636_vm4, %v975_v37, %v2009_v36 }
 0x1d1   :  { %v1154_v61 = vsel %vm700_vm8, %v1148_v51, %v2019_v44  ;;  %v1155_v62 = vsel %vm700_vm8, %v1149_v50, %v2020_v52 }
 0x1d5   :  { %v2013_v53 = vpop.permute.xlu1 %2012 }
 0x1d6   :  { %v2015_v33 = vunpack.i.h.bf16 %v2013_v53  ;;  %v2014_v28 = vunpack.i.l.bf16 %v2013_v53 }
 0x1d8   :  { %v1129_v7 = vsel %vm636_vm4, %v951_v1, %v2014_v28  ;;  %v1130_v9 = vsel %vm636_vm4, %v2812_v63, %v2015_v33 }
 0x1d9   :  { %v1135_v17 = vsel %vm700_vm8, %v1129_v7, %v2024_v10  ;;  %v1136_v19 = vsel %vm700_vm8, %v1130_v9, %v2025_v31 }
 0x1dc   :  { %v2028_v43 = vpop.permute.xlu0 %2027 }
 0x1dd   :  { %v2030_v60 = vunpack.i.h.bf16 %v2028_v43  ;;  %v2029_v56 = vunpack.i.l.bf16 %v2028_v43 }
 0x1df   :  { %v1160_v8 = vsel %vm1141_vm12, %v1154_v61, %v2029_v56  ;;  %v1161_v0 = vsel %vm1141_vm12, %v1155_v62, %v2030_v60  ;;  %v980_v62 = vld [vmem:[#allocation3 + $0x30] sm:$0xff] }
 0x1e0   :  { %v1167_v6 = vpack.c.bf16 %v1161_v0, %v1160_v8 }
 0x1e2   :  { %1362 = vmatmul.bf16.vlgmr.msra.gmra.mxu2 %v1167_v6 }
 0x1e4   :  { %v2033_v4 = vpop.permute.xlu0 %2032 }
 0x1e5   :  { %v2035_v15 = vunpack.i.h.bf16 %v2033_v4  ;;  %v2034_v16 = vunpack.i.l.bf16 %v2033_v4 }
 0x1e7   :  { %v1142_v14 = vsel %vm1141_vm12, %v1135_v17, %v2034_v16  ;;  %v1143_v21 = vsel %vm1141_vm12, %v1136_v19, %v2035_v15 }
 0x1e8   :  { %v1166_v22 = vpack.c.bf16 %v1143_v21, %v1142_v14 }
 0x1ea   :  { %1338 = vmatmul.bf16.vlgmr.msrb.gmra.mxu1 %v1166_v22 }
 0x1f5   :  { %v2048_v23 = vpop.permute.xlu2 %2047 }
 0x1f6   :  { %v2050_v63 = vunpack.i.h.bf16 %v2048_v23  ;;  %v2049_v26 = vunpack.i.l.bf16 %v2048_v23 }
 0x1fd   :  { %v2053_v57 = vpop.permute.xlu2 %2052 }
 0x1fe   :  { %v2055_v32 = vunpack.i.h.bf16 %v2053_v57  ;;  %v2054_v48 = vunpack.i.l.bf16 %v2053_v57 }
 0x209   :  { %v2038_v24 = vpop.permute.xlu1 %2037 }
 0x20a   :  { %v2040_v25 = vunpack.i.h.bf16 %v2038_v24  ;;  %v2039_v20 = vunpack.i.l.bf16 %v2038_v24 }
 0x20c   :  { %v2063_v59 = vpop.permute.xlu0 %2062  ;;  %v1151_v13 = vsel %vm636_vm4, %v978_v55, %v2040_v25  ;;  %v1150_v30 = vsel %vm636_vm4, %v977_v29, %v2039_v20  ;;  %v2097_v29 = vld [vmem:[%s3016_s2 + $0x1] ss:$0 sm:$0xff] }
 0x20d   :  { %v2065_v34 = vunpack.i.h.bf16 %v2063_v59  ;;  %v2064_v35 = vunpack.i.l.bf16 %v2063_v59  ;;  %v1156_v38 = vsel %vm700_vm8, %v1150_v30, %v2049_v26  ;;  %v1157_v39 = vsel %vm700_vm8, %v1151_v13, %v2050_v63  ;;  %v1387_v13 = vpop.f32.mrf.mxu3 }
 0x20f   :  { %v1162_v40 = vsel %vm1141_vm12, %v1156_v38, %v2064_v35  ;;  %v1163_v18 = vsel %vm1141_vm12, %v1157_v39, %v2065_v34 }
 0x210   :  { %v1170_v41 = vpack.c.bf16 %v1163_v18, %v1162_v40 }
 0x211   :  { %v2043_v2 = vpop.permute.xlu1 %2042 }
 0x212   :  { %1367 = vmatmul.bf16.gmra.mxu2 %v1170_v41  ;;  %v2045_v54 = vunpack.i.h.bf16 %v2043_v2  ;;  %v2044_v58 = vunpack.i.l.bf16 %v2043_v2 }
 0x214   :  { %v2068_v45 = vpop.permute.xlu0 %2067  ;;  %v1132_v3 = vsel %vm636_vm4, %v2841_v42, %v2045_v54  ;;  %v1131_v27 = vsel %vm636_vm4, %v2818_v5, %v2044_v58  ;;  %v979_v5 = vld [vmem:[#allocation3 + $0x28] sm:$0xff] }
 0x215   :  { %v2070_v11 = vunpack.i.h.bf16 %v2068_v45  ;;  %v2069_v36 = vunpack.i.l.bf16 %v2068_v45  ;;  %v1137_v49 = vsel %vm700_vm8, %v1131_v27, %v2054_v48  ;;  %v1138_v37 = vsel %vm700_vm8, %v1132_v3, %v2055_v32  ;;  %v1389_v18 = vpop.f32.mrf.mxu3 }
 0x217   :  { %v1144_v50 = vsel %vm1141_vm12, %v1137_v49, %v2069_v36  ;;  %v1145_v51 = vsel %vm1141_vm12, %v1138_v37, %v2070_v11 }
 0x218   :  { %v1169_v52 = vpack.c.bf16 %v1145_v51, %v1144_v50 }
 0x21a   :  { %1343 = vmatmul.bf16.gmra.mxu1 %v1169_v52 }
 0x21d   :  { %v1392_v32 = vpop.f32.mrf.mxu3 }
 0x221   :  { %v2058_v44 = vpop.permute.xlu2 %2057 }
 0x222   :  { %v2060_v56 = vunpack.i.h.bf16 %v2058_v44  ;;  %v2059_v61 = vunpack.i.l.bf16 %v2058_v44 }
 0x225   :  { %v1394_v37 = vpop.f32.mrf.mxu3 }
 0x229   :  { %v2088_v31 = vpop.permute.xlu2 %2087 }
 0x22a   :  { %v2090_v17 = vunpack.i.h.bf16 %v2088_v31  ;;  %v2089_v19 = vunpack.i.l.bf16 %v2088_v31 }
 0x237   :  { %v2073_v53 = vpop.permute.xlu0 %2072 }
 0x238   :  { %v2078_v43 = vpop.permute.xlu1 %2077  ;;  %v2075_v33 = vunpack.i.h.bf16 %v2073_v53  ;;  %v2074_v28 = vunpack.i.l.bf16 %v2073_v53 }
 0x239   :  { %v2080_v60 = vunpack.i.h.bf16 %v2078_v43  ;;  %v2079_v42 = vunpack.i.l.bf16 %v2078_v43 }
 0x23b   :  { %v1153_v8 = vsel %vm636_vm4, %v980_v62, %v2080_v60  ;;  %v1152_v0 = vsel %vm636_vm4, %v979_v5, %v2079_v42  ;;  %v1705_v42 = vld [vmem:[%s3015_s1 + $0xf0] sm:$0xff]  ;;  %v1704_v62 = vld [vmem:[%s3015_s1 + $0xe8] sm:$0xff] }
 0x23c   :  { %v1158_v1 = vsel %vm700_vm8, %v1152_v0, %v2059_v61  ;;  %v1159_v6 = vsel %vm700_vm8, %v1153_v8, %v2060_v56  ;;  %1527 = vmatpush.bf16.msra.mxu3 %v1705_v42 }
 0x23d   :  { %v1164_v47 = vsel %vm1141_vm12, %v1158_v1, %v2074_v28  ;;  %v1165_v7 = vsel %vm1141_vm12, %v1159_v6, %v2075_v33 }
 0x23e   :  { %v1173_v9 = vpack.c.bf16 %v1165_v7, %v1164_v47 }
 0x23f   :  { %v2093_v10 = vpop.permute.xlu0 %2092 }
 0x240   :  { %v2083_v4 = vpop.permute.xlu1 %2082  ;;  %1372 = vmatmul.bf16.gmra.mxu2 %v1173_v9  ;;  %v2095_v14 = vunpack.i.h.bf16 %v2093_v10  ;;  %v2094_v21 = vunpack.i.l.bf16 %v2093_v10  ;;  %1528 = vmatpush.bf16.msra.mxu3 %v1704_v62 }
 0x241   :  { %v2085_v15 = vunpack.i.h.bf16 %v2083_v4  ;;  %v2084_v16 = vunpack.i.l.bf16 %v2083_v4 }
 0x243   :  { %v1134_v22 = vsel %vm636_vm4, %v2914_v12, %v2085_v15  ;;  %v1133_v23 = vsel %vm636_vm4, %v2847_v46, %v2084_v16 }
 0x244   :  { %v1139_v24 = vsel %vm700_vm8, %v1133_v23, %v2089_v19  ;;  %v1140_v25 = vsel %vm700_vm8, %v1134_v22, %v2090_v17  ;;  %v1701_v22 = vld [vmem:[%s3015_s1 + $0xd0] sm:$0xff]  ;;  %v1700_v23 = vld [vmem:[%s3015_s1 + $0xc8] sm:$0xff] }
 0x245   :  { %v1146_v20 = vsel %vm1141_vm12, %v1139_v24, %v2094_v21  ;;  %v1147_v63 = vsel %vm1141_vm12, %v1140_v25, %v2095_v14  ;;  %v1703_v14 = vld [vmem:[%s3015_s1 + $0xe0] sm:$0xff]  ;;  %v1702_v21 = vld [vmem:[%s3015_s1 + $0xd8] sm:$0xff] }
 0x246   :  { %v1172_v26 = vpack.c.bf16 %v1147_v63, %v1146_v20  ;;  %1529 = vmatpush.bf16.msra.mxu3 %v1703_v14  ;;  %v1699_v24 = vld [vmem:[%s3015_s1 + $0xc0] sm:$0xff] }
 0x247   :  { %v1397_v33 = vpop.f32.mrf.mxu3 }
 0x248   :  { %1348 = vmatmul.bf16.gmra.mxu1 %v1172_v26  ;;  %v1433_v26 = vlaneseq }
 0x24a   :  { %1530 = vmatpush.bf16.msra.mxu3 %v1702_v21  ;;  %vm1435_vm13 = vcmp.lt.s32.totalorder %v1433_v26, 64 }
 0x24e   :  { %1531 = vmatpush.bf16.msra.mxu3 %v1701_v22 }
 0x24f   :  { %v1399_v9 = vpop.f32.mrf.mxu3 }
 0x252   :  { %1532 = vmatpush.bf16.msra.mxu3 %v1700_v23 }
 0x256   :  { %1533 = vmatpush.bf16.msra.mxu3 %v1699_v24 }
 0x265   :  { %v1363_v55 = vpop.f32.mrf.mxu2 }
 0x267   :  { %v1339_v59 = vpop.f32.mrf.mxu1 }
 0x268   :  { %v1340_v12 = vadd.f32 %v2097_v29, %v1339_v59 }
 0x26a   :  { %v1364_v30 = vadd.f32 %v1363_v55, %v1340_v12  ;;  %v1698_v12 = vld [vmem:[%s3015_s1 + $0xb8] sm:$0xff] }
 0x26b   :  { %1534 = vmatpush.bf16.msra.mxu3 %v1698_v12 }
 0x26c   :  { %v1388_v46 = vadd.f32 %v1387_v13, %v1364_v30 }
 0x26d   :  { %v1365_v39 = vpop.f32.mrf.mxu2 }
 0x26e   :  { %v1402_v34 = vmax.f32 %v1388_v46, 0.0 }
 0x26f   :  { %v1341_v35 = vpop.f32.mrf.mxu1 }
 0x270   :  { %1408 = vst.msk [vmem:[#allocation4] sm:$0xff] %vm700_vm8, %v1402_v34  ;;  %v1342_v38 = vadd.f32 %v2097_v29, %v1341_v35 }
 0x272   :  { %v1366_v40 = vadd.f32 %v1365_v39, %v1342_v38 }
 0x274   :  { %v1390_v41 = vadd.f32 %v1389_v18, %v1366_v40 }
 0x276   :  { %v1403_v57 = vmax.f32 %v1390_v41, 0.0 }
 0x277   :  { %v1415_v20 = vld [vmem:[#allocation4 + $0x5] sm:$0x3] }
 0x278   :  { %1409 = vst.msk [vmem:[#allocation4 + $0x8] sm:$0xff] %vm700_vm8, %v1403_v57  ;;  %v2098_v57 = vld [vmem:[%s3016_s2 + $0x2] ss:$0 sm:$0xff] }
 0x27f   :  { %v1422_v52 = vld [vmem:[#allocation4 + $0xd] sm:$0x3]  ;;  %v1416_v25 = vld [vmem:[#allocation4 + $0x9] sm:$0x3] }
 0x280   :  { %v1417_v63 = vmax.f32 %v1415_v20, %v1416_v25 }
 0x295   :  { %v1368_v2 = vpop.f32.mrf.mxu2 }
 0x297   :  { %v1344_v54 = vpop.f32.mrf.mxu1 }
 0x298   :  { %v1345_v58 = vadd.f32 %v2097_v29, %v1344_v54 }
 0x29a   :  { %v1369_v48 = vadd.f32 %v1368_v2, %v1345_v58 }
 0x29c   :  { %v1393_v45 = vadd.f32 %v1392_v32, %v1369_v48 }
 0x29d   :  { %v1370_v36 = vpop.f32.mrf.mxu2 }
 0x29e   :  { %v1404_v3 = vmax.f32 %v1393_v45, 0.0 }
 0x29f   :  { %v1346_v27 = vpop.f32.mrf.mxu1 }
 0x2a0   :  { %1410 = vst.msk [vmem:[#allocation4 + $0x10] sm:$0xff] %vm700_vm8, %v1404_v3  ;;  %v1347_v11 = vadd.f32 %v2097_v29, %v1346_v27 }
 0x2a2   :  { %v1371_v49 = vadd.f32 %v1370_v36, %v1347_v11 }
 0x2a4   :  { %v1395_v50 = vadd.f32 %v1394_v37, %v1371_v49 }
 0x2a6   :  { %v1405_v51 = vmax.f32 %v1395_v50, 0.0 }
 0x2a7   :  { %v1423_v44 = vld [vmem:[#allocation4 + $0x11] sm:$0x3] }
 0x2a8   :  { %1411 = vst.msk [vmem:[#allocation4 + $0x18] sm:$0xff] %vm700_vm8, %v1405_v51  ;;  %v1424_v53 = vmax.f32 %v1422_v52, %v1423_v44 }
 0x2aa   :  { %v1426_v43 = vrot.slane %v1424_v53, 1 }
 0x2ac   :  { %v1428_v60 = vmax.f32 %v1424_v53, %v1426_v43 }
 0x2ae   :  { %1430 = vrot.lane.b32.xlu1 %v1428_v60, %s2105_s27 }
 0x2af   :  { %v1439_v46 = vld [vmem:[#allocation4 + $0x1d] sm:$0x3] }
 0x2c3   :  { %v1373_v56 = vpop.f32.mrf.mxu2 }
 0x2c5   :  { %v1349_v61 = vpop.f32.mrf.mxu1 }
 0x2c6   :  { %v1350_v5 = vadd.f32 %v2097_v29, %v1349_v61 }
 0x2c8   :  { %v1374_v28 = vadd.f32 %v1373_v56, %v1350_v5 }
 0x2ca   :  { %v1398_v8 = vadd.f32 %v1397_v33, %v1374_v28 }
 0x2cb   :  { %v1375_v47 = vpop.f32.mrf.mxu2 }
 0x2cc   :  { %v1406_v0 = vmax.f32 %v1398_v8, 0.0 }
 0x2cd   :  { %v1351_v1 = vpop.f32.mrf.mxu1 }
 0x2ce   :  { %1412 = vst.msk [vmem:[#allocation4 + $0x20] sm:$0xff] %vm700_vm8, %v1406_v0  ;;  %v1352_v6 = vadd.f32 %v2097_v29, %v1351_v1  ;;  %v1419_v29 = vrot.slane %v1417_v63, 1 }
 0x2d0   :  { %v1376_v7 = vadd.f32 %v1375_v47, %v1352_v6  ;;  %v1421_v55 = vmax.f32 %v1417_v63, %v1419_v29 }
 0x2d2   :  { %v1400_v31 = vadd.f32 %v1399_v9, %v1376_v7 }
 0x2d4   :  { %v1407_v10 = vmax.f32 %v1400_v31, 0.0 }
 0x2d5   :  { %v1446_v4 = vld [vmem:[#allocation4 + $0x25] sm:$0x3]  ;;  %v1440_v30 = vld [vmem:[#allocation4 + $0x21] sm:$0x3] }
 0x2d6   :  { %1413 = vst.msk [vmem:[#allocation4 + $0x28] sm:$0xff] %vm700_vm8, %v1407_v10  ;;  %v1441_v34 = vmax.f32 %v1439_v46, %v1440_v30 }
 0x2d8   :  { %v1443_v35 = vrot.slane %v1441_v34, 1 }
 0x2da   :  { %v1445_v38 = vmax.f32 %v1441_v34, %v1443_v35 }
 0x2dd   :  { %v1447_v15 = vld [vmem:[#allocation4 + $0x29] sm:$0x3] }
 0x2de   :  { %v1448_v16 = vmax.f32 %v1446_v4, %v1447_v15 }
 0x2e0   :  { %v1450_v17 = vrot.slane %v1448_v16, 1 }
 0x2e2   :  { %v1452_v19 = vmax.f32 %v1448_v16, %v1450_v17 }
 0x2e4   :  { %1454 = vrot.lane.b32.xlu2 %v1452_v19, %s2105_s27 }
 0x320   :  { %v1431_v59 = vpop.permute.xlu1 %1430 }
 0x321   :  { %v1437_v13 = vsel %vm1435_vm13, %v1421_v55, %v1431_v59 }
 0x322   :  { %1438 = vst [vmem:[#allocation5] sm:$0x1] %v1437_v13 }
 0x33e   :  { %v1455_v39 = vpop.permute.xlu2 %1454 }
 0x33f   :  { %v1457_v40 = vsel %vm1435_vm13, %v1445_v38, %v1455_v39 }
 0x340   :  { %1458 = vst [vmem:[#allocation5 + $0x1] sm:$0x1] %v1457_v40 }
 0x347   :  { %v1459_v18 = vld [vmem:[#allocation5] sm:$0xff] }
 0x348   :  { %v1460_v41 = vpack.c.bf16 %v1459_v18, %v1459_v18 }
 0x34a   :  { %1535 = vmatmul.bf16.vlgmr.msra.gmra.mxu3 %v1460_v41 }
 0x3cd   :  { %v1536_v2 = vpop.f32.mrf.mxu3 }
 0x3ce   :  { %v1537_v54 = vadd.f32 %v2098_v57, %v1536_v2 }
 0x3d0   :  { %1540 = vst [vmem:[%s3017_s3] sm:$0xff] %v1537_v54 }
 0x3d5   :  { %v1538_v58 = vpop.f32.mrf.mxu3 }

</bundles_post_ra>
